<compile_context>
chip_gen: v6e
topology: v6e:2x2x1
jax: 0.10.0
libtpu: 0.0.40
codegen_flags: <defaults>
</compile_context>

<pallas_src>
import jax
import jax.numpy as jnp
from jax.experimental import pallas as pl
from jax.experimental.pallas import tpu as pltpu

# ----------------------------- configuration --------------------------------
DIM = 32                           # in_features (= out_features)
MLP_HIDDEN = int(DIM * 4.0)        # hidden_features = dim * mlp_ratio (4.0)
LANES = 128                        # TPU lane width
_ROW_TILE_PACKED = 1024            # packed rows per grid step (= 4096 tokens)
_VMEM_LIMIT_BYTES = 32 * 1024 * 1024


# ------------------------------- kernel --------------------------------------
def _gelu_erf(x):
    # PyTorch nn.GELU() default = exact erf GELU.  lax.erf lowering is not
    # guaranteed in Mosaic, so use the Abramowitz-Stegun 7.1.26 rational
    # approximation built from supported primitives.  The divide is routed to
    # the EUP via pl.reciprocal(approx=True); overall accuracy ~1e-4 (well
    # inside the 1e-2 test tolerance), and the VALU (binding unit at large M)
    # does not pay for it.
    z = x * 0.7071067811865476
    az = jnp.abs(z)
    t = pl.reciprocal(1.0 + 0.3275911 * az, approx=True)
    poly = ((((1.061405429 * t - 1.453152027) * t + 1.421413741) * t
             - 0.284496736) * t + 0.254829592) * t
    erf_abs = 1.0 - poly * jnp.exp(-az * az)
    erf = jnp.where(z >= 0.0, erf_abs, -erf_abs)
    return 0.5 * x * (1.0 + erf)


def _mlp_kernel(x_ref, w1_ref, b1_ref, w2_ref, b2_ref, o_ref):
    # Fully fused fc1 -> GELU -> fc2; the hidden activation never leaves VMEM.
    # Matmul operands are bf16 (MXU-native), accumulation and GELU are f32.
    x = x_ref[...]                                                   # (T, 128) bf16
    h = jnp.dot(x, w1_ref[...],
                preferred_element_type=jnp.float32) + b1_ref[...]    # (T, 512) f32
    h = _gelu_erf(h)
    y = jnp.dot(h.astype(w2_ref.dtype), w2_ref[...],
                preferred_element_type=jnp.float32) + b2_ref[...]    # (T, 128) f32
    o_ref[...] = y.astype(o_ref.dtype)


# --------------------------- parameter packing --------------------------------
def pack_params(params, compute_dtype=jnp.bfloat16):
    """One-time prep: block-diagonal (lane-dense) bf16 weights + tiled f32 biases.

    With C=32, four tokens are packed into one 128-lane row; the block-diagonal
    weights make  [x0|x1|x2|x3] @ w1_bd == [x0@W1|x1@W1|x2@W1|x3@W1].
    """
    w1, b1 = params['fc1_w'], params['fc1_b']
    w2, b2 = params['fc2_w'], params['fc2_b']
    cin, hid = w1.shape
    cout = w2.shape[1]
    pack = LANES // cin if (LANES % cin == 0 and cin < LANES) else 1
    eye = jnp.eye(pack, dtype=w1.dtype)
    return dict(
        w1=jnp.kron(eye, w1).astype(compute_dtype),           # (pack*cin, pack*hid)
        b1=jnp.tile(b1, pack).reshape(1, pack * hid).astype(jnp.float32),
        w2=jnp.kron(eye, w2).astype(compute_dtype),           # (pack*hid, pack*cout)
        b2=jnp.tile(b2, pack).reshape(1, pack * cout).astype(jnp.float32),
    )


# ------------------------------ wrapper ---------------------------------------
def mlp_forward(x, packed):
    """x: (..., C) -> (..., C_out). Flattens leading dims, packs rows lane-dense."""
    w1, b1, w2, b2 = packed['w1'], packed['b1'], packed['w2'], packed['b2']
    cin = x.shape[-1]
    pack = w1.shape[0] // cin                    # static (from array shapes)
    cout = w2.shape[1] // pack
    lead = x.shape[:-1]
    out_dtype = x.dtype

    x2d = x.reshape(-1, cin)
    m = x2d.shape[0]

    # Pad the token count to a multiple of the packing factor, then pack 4
    # tokens per 128-lane row (row-major reshape: metadata only).
    m4 = -(-m // pack) * pack
    if m4 != m:
        x2d = jnp.pad(x2d, ((0, m4 - m), (0, 0)))
    xp = x2d.reshape(m4 // pack, pack * cin).astype(w1.dtype)       # (mp, 128) bf16
    mp = xp.shape[0]

    if mp > _ROW_TILE_PACKED:
        # ---- large-M path: row-tiled, cdiv grid + zero-padded ragged tail ----
        grid_m = pl.cdiv(mp, _ROW_TILE_PACKED)
        mp_pad = grid_m * _ROW_TILE_PACKED
        if mp_pad != mp:
            xp = jnp.pad(xp, ((0, mp_pad - mp), (0, 0)))
        yp = pl.pallas_call(
            _mlp_kernel,
            out_shape=jax.ShapeDtypeStruct((mp_pad, pack * cout), out_dtype),
            grid=(grid_m,),
            in_specs=[
                pl.BlockSpec((_ROW_TILE_PACKED, pack * cin), lambda i: (i, 0)),
                pl.BlockSpec(w1.shape, lambda i: (0, 0)),   # weights broadcast /
                pl.BlockSpec(b1.shape, lambda i: (0, 0)),   # VMEM-resident across
                pl.BlockSpec(w2.shape, lambda i: (0, 0)),   # all row tiles
                pl.BlockSpec(b2.shape, lambda i: (0, 0)),
            ],
            out_specs=pl.BlockSpec((_ROW_TILE_PACKED, pack * cout),
                                   lambda i: (i, 0)),
            compiler_params=pltpu.CompilerParams(
                dimension_semantics=("parallel",),          # megacore on v7x
                vmem_limit_bytes=_VMEM_LIMIT_BYTES),
        )(xp, w1, b1, w2, b2)
        yp = yp[:mp]
    else:
        # ---- small-M path: one invocation, no grid, full-array VMEM blocks ----
        vmem = pl.BlockSpec(memory_space=pltpu.MemorySpace.VMEM)
        yp = pl.pallas_call(
            _mlp_kernel,
            out_shape=jax.ShapeDtypeStruct((mp, pack * cout), out_dtype),
            in_specs=[vmem, vmem, vmem, vmem, vmem],
            out_specs=vmem,
        )(xp, w1, b1, w2, b2)

    y = yp.reshape(m4, cout)[:m]
    return y.reshape(*lead, cout)


# ------------------------------ parameters ------------------------------------
def init_params(key):
    ks = jax.random.split(key, 4)

    def w(k, shape, scale=0.05):
        return (scale * jax.random.normal(k, shape)).astype(jnp.float32)

    # Linear weights stored as (in_features, out_features) == torch weight.T
    return dict(
        fc1_w=w(ks[0], (DIM, MLP_HIDDEN)),
        fc1_b=w(ks[1], (MLP_HIDDEN,)),
        fc2_w=w(ks[2], (MLP_HIDDEN, DIM)),
        fc2_b=w(ks[3], (DIM,)),
    )


# ------------------------------ reference -------------------------------------
def mlp_reference(x, p):
    h = x @ p['fc1_w'] + p['fc1_b']
    h = jax.nn.gelu(h, approximate=False)          # exact erf GELU (PyTorch default)
    return h @ p['fc2_w'] + p['fc2_b']


# --------------------------------- main ---------------------------------------
if __name__ == "__main__":
    key = jax.random.PRNGKey(0)
    k_in, k_par, k_in2 = jax.random.split(key, 3)

    params = init_params(k_par)
    packed = pack_params(params)
    fwd = jax.jit(mlp_forward)

    # 1) Production-like shape (small-M fused path): (B, S, N, C) tokens.
    B, S, N = 2, 2, 64
    x = jax.random.normal(k_in, (B, S, N, DIM), dtype=jnp.float32)
    out = jax.block_until_ready(fwd(x, packed))
    assert out.shape == (B, S, N, DIM)
    assert bool(jnp.all(jnp.isfinite(out)))
    ref = mlp_reference(x, params)
    err_small = float(jnp.max(jnp.abs(out - ref)))
    # Tolerance covers bf16 matmul operands + erf/reciprocal approximations.
    assert err_small < 1e-2, f"small-path max abs error {err_small}"

    # 2) Exercise the tiled large-M path (non-divisible row count -> cdiv + pad).
    x_big = jax.random.normal(k_in2, (1, 130, 32, DIM), dtype=jnp.float32)  # 4160 rows
    out_big = jax.block_until_ready(fwd(x_big, packed))
    assert out_big.shape == x_big.shape
    err_big = float(jnp.max(jnp.abs(out_big - mlp_reference(x_big, params))))
    assert err_big < 1e-2, f"tiled-path max abs error {err_big}"

    print("KERNEL_OK")
</pallas_src>

<mosaic_0001>
module attributes {stable_mosaic.version = 11 : i64} {
  func.func @_mlp_kernel(%arg0: memref<64x128xbf16, #tpu.memory_space<vmem>>, %arg1: memref<128x512xbf16, #tpu.memory_space<vmem>>, %arg2: memref<1x512xf32, #tpu.memory_space<vmem>>, %arg3: memref<512x128xbf16, #tpu.memory_space<vmem>>, %arg4: memref<1x128xf32, #tpu.memory_space<vmem>>, %arg5: memref<64x128xf32, #tpu.memory_space<vmem>>) attributes {dimension_semantics = [], scalar_prefetch = 0 : i64, scratch_operands = 0 : i64, tpu.core_type = #tpu.core_type<tc>} {
    %c0 = arith.constant 0 : index
    %c0_0 = arith.constant 0 : index
    %0 = vector.load %arg0[%c0, %c0_0] : memref<64x128xbf16, #tpu.memory_space<vmem>>, vector<64x128xbf16>
    %c0_1 = arith.constant 0 : index
    %c0_2 = arith.constant 0 : index
    %1 = vector.load %arg1[%c0_1, %c0_2] : memref<128x512xbf16, #tpu.memory_space<vmem>>, vector<128x512xbf16>
    %cst = arith.constant dense<0.000000e+00> : vector<64x512xf32>
    %2 = tpu.matmul %0, %1, %cst {dimension_numbers = #tpu.dot_dimension_numbers<[1], [0], [0], [1], [0, 0, 1, 1], [], []>} : vector<64x128xbf16>, vector<128x512xbf16>, vector<64x512xf32> -> vector<64x512xf32>
    %c0_3 = arith.constant 0 : index
    %c0_4 = arith.constant 0 : index
    %3 = vector.load %arg2[%c0_3, %c0_4] : memref<1x512xf32, #tpu.memory_space<vmem>>, vector<1x512xf32>
    %4 = vector.broadcast %3 : vector<1x512xf32> to vector<64x512xf32>
    %5 = arith.addf %2, %4 : vector<64x512xf32>
    %cst_5 = arith.constant 0.707106769 : f32
    %6 = vector.broadcast %cst_5 : f32 to vector<64x512xf32>
    %7 = arith.mulf %5, %6 : vector<64x512xf32>
    %8 = math.absf %7 : vector<64x512xf32>
    %cst_6 = arith.constant 0.327591091 : f32
    %9 = vector.broadcast %cst_6 : f32 to vector<64x512xf32>
    %10 = arith.mulf %9, %8 : vector<64x512xf32>
    %cst_7 = arith.constant 1.000000e+00 : f32
    %11 = vector.broadcast %cst_7 : f32 to vector<64x512xf32>
    %12 = arith.addf %11, %10 : vector<64x512xf32>
    %13 = tpu.reciprocal %12 {approx = true} : vector<64x512xf32> -> vector<64x512xf32>
    %cst_8 = arith.constant 1.06140542 : f32
    %14 = vector.broadcast %cst_8 : f32 to vector<64x512xf32>
    %15 = arith.mulf %14, %13 : vector<64x512xf32>
    %cst_9 = arith.constant 1.45315206 : f32
    %16 = vector.broadcast %cst_9 : f32 to vector<64x512xf32>
    %17 = arith.subf %15, %16 : vector<64x512xf32>
    %18 = arith.mulf %17, %13 : vector<64x512xf32>
    %cst_10 = arith.constant 1.42141378 : f32
    %19 = vector.broadcast %cst_10 : f32 to vector<64x512xf32>
    %20 = arith.addf %18, %19 : vector<64x512xf32>
    %21 = arith.mulf %20, %13 : vector<64x512xf32>
    %cst_11 = arith.constant 0.284496725 : f32
    %22 = vector.broadcast %cst_11 : f32 to vector<64x512xf32>
    %23 = arith.subf %21, %22 : vector<64x512xf32>
    %24 = arith.mulf %23, %13 : vector<64x512xf32>
    %cst_12 = arith.constant 0.254829586 : f32
    %25 = vector.broadcast %cst_12 : f32 to vector<64x512xf32>
    %26 = arith.addf %24, %25 : vector<64x512xf32>
    %27 = arith.mulf %26, %13 : vector<64x512xf32>
    %cst_13 = arith.constant 0.000000e+00 : f32
    %28 = vector.broadcast %cst_13 : f32 to vector<64x512xf32>
    %29 = arith.subf %28, %8 : vector<64x512xf32>
    %30 = arith.mulf %29, %8 : vector<64x512xf32>
    %31 = math.exp %30 : vector<64x512xf32>
    %32 = arith.mulf %27, %31 : vector<64x512xf32>
    %cst_14 = arith.constant 1.000000e+00 : f32
    %33 = vector.broadcast %cst_14 : f32 to vector<64x512xf32>
    %34 = arith.subf %33, %32 : vector<64x512xf32>
    %cst_15 = arith.constant 0.000000e+00 : f32
    %35 = vector.broadcast %cst_15 : f32 to vector<64x512xf32>
    %36 = arith.cmpf oge, %7, %35 : vector<64x512xf32>
    %cst_16 = arith.constant 0.000000e+00 : f32
    %37 = vector.broadcast %cst_16 : f32 to vector<64x512xf32>
    %38 = arith.subf %37, %34 : vector<64x512xf32>
    %39 = arith.select %36, %34, %38 : vector<64x512xi1>, vector<64x512xf32>
    %cst_17 = arith.constant 5.000000e-01 : f32
    %40 = vector.broadcast %cst_17 : f32 to vector<64x512xf32>
    %41 = arith.mulf %40, %5 : vector<64x512xf32>
    %cst_18 = arith.constant 1.000000e+00 : f32
    %42 = vector.broadcast %cst_18 : f32 to vector<64x512xf32>
    %43 = arith.addf %42, %39 : vector<64x512xf32>
    %44 = arith.mulf %41, %43 : vector<64x512xf32>
    %45 = arith.truncf %44 : vector<64x512xf32> to vector<64x512xbf16>
    %c0_19 = arith.constant 0 : index
    %c0_20 = arith.constant 0 : index
    %46 = vector.load %arg3[%c0_19, %c0_20] : memref<512x128xbf16, #tpu.memory_space<vmem>>, vector<512x128xbf16>
    %cst_21 = arith.constant dense<0.000000e+00> : vector<64x128xf32>
    %47 = tpu.matmul %45, %46, %cst_21 {dimension_numbers = #tpu.dot_dimension_numbers<[1], [0], [0], [1], [0, 0, 1, 1], [], []>} : vector<64x512xbf16>, vector<512x128xbf16>, vector<64x128xf32> -> vector<64x128xf32>
    %c0_22 = arith.constant 0 : index
    %c0_23 = arith.constant 0 : index
    %48 = vector.load %arg4[%c0_22, %c0_23] : memref<1x128xf32, #tpu.memory_space<vmem>>, vector<1x128xf32>
    %49 = vector.broadcast %48 : vector<1x128xf32> to vector<64x128xf32>
    %50 = arith.addf %47, %49 : vector<64x128xf32>
    %c0_24 = arith.constant 0 : index
    %c0_25 = arith.constant 0 : index
    %51 = vector.load %arg5[%c0_24, %c0_25] : memref<64x128xf32, #tpu.memory_space<vmem>>, vector<64x128xf32>
    tpu.vector_store %arg5[%c0_24, %c0_25], %50 {strides = array<i32>} : memref<64x128xf32, #tpu.memory_space<vmem>>, vector<64x128xf32>,
    return
  }
}

</mosaic_0001>

<bundles_post_ra>
// kernel: mlp_forward.1
= control target key start
LH: loop header
LB: loop body
LE: loop exit
PB: predicated region body
PF: predicated region fallthrough
CT: control target
= control target key end

     0   :  { %v2092_v1 = vmov 0   ;;  %v63_v37 = vlaneseq  ;;  %s3373_s1 = inlined_call_operand.vmem [shape: bf16[128,512], index: 1, kind: input, shape index: {}]   ;;  %s3374_s0 = inlined_call_operand.vmem [shape: bf16[64,128], index: 0, kind: input, shape index: {}]   ;;  %s3375_s2 = inlined_call_operand.vmem [shape: f32[1,512], index: 2, kind: input, shape index: {}]   ;;  %s3376_s3 = inlined_call_operand.vmem [shape: bf16[512,128], index: 3, kind: input, shape index: {}]   ;;  %s3377_s4 = inlined_call_operand.vmem [shape: f32[1,128], index: 4, kind: input, shape index: {}]   ;;  %s3378_s5 = inlined_call_operand.vmem [shape: f32[64,128], index: 5, kind: output, shape index: {}]  }
   0x1   :  { %v1880_v0 = vld [vmem:[%s3373_s1 + $0xe4] ss:$16 sps:$4 sm:$0xff]   ;;  %299 = vmatprep.mubr.bf16.mxu0 %v2092_v1  ;;  %372 = vmatprep.mubr.bf16.mxu1 %v2092_v1  ;;  %v1882_v2 = vld [vmem:[%s3373_s1 + $0xec] ss:$16 sps:$4 sm:$0xff]   ;;  %v1884_v3 = vld [vmem:[%s3373_s1 + $0xe0] ss:$16 sps:$4 sm:$0xff]  }
   0x2   :  { %267 = vmatprep.subr.bf16.mxu0 %v1880_v0  ;;  %v1885_v4 = vld [vmem:[%s3373_s1 + $0xe8] ss:$16 sps:$4 sm:$0xff]   ;;  %340 = vmatprep.subr.bf16.mxu1 %v1882_v2  ;;  %v1886_v5 = vld [vmem:[%s3373_s1 + $0xc4] ss:$16 sps:$4 sm:$0xff]   ;;  %v1888_v6 = vld [vmem:[%s3373_s1 + $0xcc] ss:$16 sps:$4 sm:$0xff]  }
   0x3   :  { %268 = vmatpush1.bf16.msra.mxu0 %v1884_v3  ;;  %341 = vmatpush1.bf16.msra.mxu1 %v1885_v4  ;;  %v1890_v7 = vld [vmem:[%s3373_s1 + $0xc0] ss:$16 sps:$4 sm:$0xff]   ;;  %v1891_v8 = vld [vmem:[%s3373_s1 + $0xc8] ss:$16 sps:$4 sm:$0xff]   ;;  %v1892_v9 = vld [vmem:[%s3373_s1 + $0xa4] ss:$16 sps:$4 sm:$0xff]  }
   0x4   :  { %269 = vmatprep.subr.bf16.mxu0 %v1886_v5  ;;  %342 = vmatprep.subr.bf16.mxu1 %v1888_v6  ;;  %v1894_v10 = vld [vmem:[%s3373_s1 + $0xac] ss:$16 sps:$4 sm:$0xff]   ;;  %v1896_v11 = vld [vmem:[%s3373_s1 + $0xa0] ss:$16 sps:$4 sm:$0xff]   ;;  %v1897_v12 = vld [vmem:[%s3373_s1 + $0xa8] ss:$16 sps:$4 sm:$0xff]  }
   0x5   :  { %v1898_v13 = vld [vmem:[%s3373_s1 + $0x84] ss:$16 sps:$4 sm:$0xff]   ;;  %v1900_v14 = vld [vmem:[%s3373_s1 + $0x8c] ss:$16 sps:$4 sm:$0xff]   ;;  %v1902_v15 = vld [vmem:[%s3373_s1 + $0x80] ss:$16 sps:$4 sm:$0xff]  }
   0x6   :  { %v1903_v16 = vld [vmem:[%s3373_s1 + $0x88] ss:$16 sps:$4 sm:$0xff]   ;;  %v1904_v17 = vld [vmem:[%s3373_s1 + $0x64] ss:$16 sps:$4 sm:$0xff]   ;;  %v1906_v18 = vld [vmem:[%s3373_s1 + $0x6c] ss:$16 sps:$4 sm:$0xff]  }
   0x7   :  { %270 = vmatpush1.bf16.msra.mxu0 %v1890_v7  ;;  %343 = vmatpush1.bf16.msra.mxu1 %v1891_v8  ;;  %v1908_v19 = vld [vmem:[%s3373_s1 + $0x60] ss:$16 sps:$4 sm:$0xff]   ;;  %v1909_v20 = vld [vmem:[%s3373_s1 + $0x68] ss:$16 sps:$4 sm:$0xff]   ;;  %v1910_v21 = vld [vmem:[%s3373_s1 + $0x44] ss:$16 sps:$4 sm:$0xff]  }
   0x8   :  { %271 = vmatprep.subr.bf16.mxu0 %v1892_v9  ;;  %344 = vmatprep.subr.bf16.mxu1 %v1894_v10  ;;  %v1912_v22 = vld [vmem:[%s3373_s1 + $0x4c] ss:$16 sps:$4 sm:$0xff]   ;;  %v1914_v23 = vld [vmem:[%s3373_s1 + $0x40] ss:$16 sps:$4 sm:$0xff]   ;;  %v1915_v24 = vld [vmem:[%s3373_s1 + $0x48] ss:$16 sps:$4 sm:$0xff]  }
   0x9   :  { %v1916_v25 = vld [vmem:[%s3373_s1 + $0x24] ss:$16 sps:$4 sm:$0xff]   ;;  %v1918_v26 = vld [vmem:[%s3373_s1 + $0x2c] ss:$16 sps:$4 sm:$0xff]   ;;  %v1920_v27 = vld [vmem:[%s3373_s1 + $0x20] ss:$16 sps:$4 sm:$0xff]  }
   0xa   :  { %v1921_v28 = vld [vmem:[%s3373_s1 + $0x28] ss:$16 sps:$4 sm:$0xff]   ;;  %v1922_v29 = vld [vmem:[%s3373_s1 + $0x4] ss:$16 sps:$4 sm:$0xff]   ;;  %v1924_v30 = vld [vmem:[%s3373_s1 + $0xc] ss:$16 sps:$4 sm:$0xff]  }
   0xb   :  { %272 = vmatpush1.bf16.msra.mxu0 %v1896_v11  ;;  %345 = vmatpush1.bf16.msra.mxu1 %v1897_v12  ;;  %v1926_v31 = vld [vmem:[%s3373_s1] ss:$16 sps:$4 sm:$0xff]   ;;  %v1927_v32 = vld [vmem:[%s3373_s1 + $0x8] ss:$16 sps:$4 sm:$0xff]   ;;  %v64_v38 = vshrl.u32 %v63_v37, 7 }
   0xc   :  { %273 = vmatprep.subr.bf16.mxu0 %v1898_v13  ;;  %346 = vmatprep.subr.bf16.mxu1 %v1900_v14  ;;  %v1928_v33 = vld [vmem:[%s3374_s0] sm:$0xff]   ;;  %v1929_v34 = vld [vmem:[%s3374_s0 + $0x8] sm:$0xff]   ;;  %v1930_v35 = vld [vmem:[%s3374_s0 + $0x10] sm:$0xff]  }
   0xd   :  { %v1931_v36 = vld [vmem:[%s3374_s0 + $0x18] sm:$0xff]   ;;  %v65_v39 = vsub.s32 0, %v64_v38  ;;  %v73_v40 = vsub.s32 2, %v64_v38  ;;  %v61_v41 = vld [vmem:[%s3375_s2] sm:$0xf]  ;;  %v69_v42 = vsub.s32 1, %v64_v38 }
   0xe   :  { %v77_v43 = vsub.s32 3, %v64_v38 }
   0xf   :  { %274 = vmatpush1.bf16.msra.mxu0 %v1902_v15  ;;  %347 = vmatpush1.bf16.msra.mxu1 %v1903_v16  ;;  %v2242_v44 = vrot.slane %v61_v41, %v65_v39  ;;  %v2244_v45 = vrot.slane %v61_v41, %v73_v40  ;;  %v2246_v48 = vrot.slane %v61_v41, %v69_v42 }
  0x10   :  { %275 = vmatprep.subr.bf16.mxu0 %v1904_v17  ;;  %348 = vmatprep.subr.bf16.mxu1 %v1906_v18  ;;  %v2248_v49 = vrot.slane %v61_v41, %v77_v43 }
  0x11   :  { %3421 = vst [vmem:[#allocation2_spill] sm:$0xff] %v2246_v48 }
  0x12   :  { %3422 = vst [vmem:[#allocation3_spill] sm:$0xff] %v2248_v49 }
  0x13   :  { %276 = vmatpush1.bf16.msra.mxu0 %v1908_v19  ;;  %349 = vmatpush1.bf16.msra.mxu1 %v1909_v20 }
  0x14   :  { %277 = vmatprep.subr.bf16.mxu0 %v1910_v21  ;;  %350 = vmatprep.subr.bf16.mxu1 %v1912_v22 }
  0x17   :  { %278 = vmatpush1.bf16.msra.mxu0 %v1914_v23  ;;  %351 = vmatpush1.bf16.msra.mxu1 %v1915_v24 }
  0x18   :  { %279 = vmatprep.subr.bf16.mxu0 %v1916_v25  ;;  %352 = vmatprep.subr.bf16.mxu1 %v1918_v26 }
  0x1b   :  { %280 = vmatpush1.bf16.msra.mxu0 %v1920_v27  ;;  %353 = vmatpush1.bf16.msra.mxu1 %v1921_v28 }
  0x1c   :  { %281 = vmatprep.subr.bf16.mxu0 %v1922_v29  ;;  %354 = vmatprep.subr.bf16.mxu1 %v1924_v30 }
  0x1f   :  { %282 = vmatpush1.bf16.msra.mxu0 %v1926_v31  ;;  %355 = vmatpush1.bf16.msra.mxu1 %v1927_v32 }
  0x22   :  { %300 = vmatmul.mubr.bf16.vlgmr.msra.gmra.mxu0 %v1928_v33  ;;  %373 = vmatmul.mubr.bf16.vlgmr.msra.gmra.mxu1 %v1928_v33 }
  0x23   :  { %309 = vmatprep.mubr.bf16.mxu0 %v2092_v1  ;;  %382 = vmatprep.mubr.bf16.mxu1 %v2092_v1 }
  0x2a   :  { %310 = vmatmul.mubr.bf16.gmra.mxu0 %v1929_v34  ;;  %383 = vmatmul.mubr.bf16.gmra.mxu1 %v1929_v34 }
  0x2b   :  { %319 = vmatprep.mubr.bf16.mxu0 %v2092_v1  ;;  %392 = vmatprep.mubr.bf16.mxu1 %v2092_v1 }
  0x32   :  { %320 = vmatmul.mubr.bf16.gmra.mxu0 %v1930_v35  ;;  %393 = vmatmul.mubr.bf16.gmra.mxu1 %v1930_v35 }
  0x33   :  { %329 = vmatprep.mubr.bf16.mxu0 %v2092_v1  ;;  %402 = vmatprep.mubr.bf16.mxu1 %v2092_v1 }
  0x3a   :  { %330 = vmatmul.mubr.bf16.gmra.mxu0 %v1931_v36  ;;  %403 = vmatmul.mubr.bf16.gmra.mxu1 %v1931_v36 }
  0xe2   :  { %v301_v46 = vpop.f32.mrf.mxu0  ;;  %v374_v47 = vpop.f32.mrf.mxu1 }
  0xe3   :  { %v2251_v50 = vadd.f32 %v301_v46, %v2242_v44  ;;  %v2254_v51 = vadd.f32 %v374_v47, %v2244_v45 }
  0xe4   :  { %v303_v52 = vpop.f32.mrf.mxu0  ;;  %v376_v53 = vpop.f32.mrf.mxu1 }
  0xe5   :  { %v2257_v54 = vmul.f32 0.70710677, %v2251_v50  ;;  %v2260_v55 = vmul.f32 0.70710677, %v2254_v51  ;;  %v2263_v56 = vadd.f32 %v303_v52, %v2246_v48  ;;  %v2266_v57 = vadd.f32 %v376_v53, %v2248_v49 }
  0xe6   :  { %v305_v0 = vpop.f32.mrf.mxu0  ;;  %v378_v8 = vpop.f32.mrf.mxu1 }
  0xe7   :  { %v2269_v58 = vand.u32 2147483647, %v2257_v54  ;;  %v2272_v59 = vand.u32 2147483647, %v2260_v55  ;;  %v2275_v60 = vmul.f32 0.70710677, %v2263_v56  ;;  %v2291_v7 = vadd.f32 %v305_v0, %v2242_v44 }
  0xe8   :  { %v2278_v61 = vmul.f32 0.70710677, %v2266_v57  ;;  %v307_v9 = vpop.f32.mrf.mxu0  ;;  %v2297_v13 = vadd.f32 %v378_v8, %v2244_v45  ;;  %v380_v18 = vpop.f32.mrf.mxu1  ;;  %vm1053_vm0 = vcmp.ge.f32.partialorder %v2257_v54, 0.0  ;;  %vm1055_vm1 = vcmp.ge.f32.partialorder %v2260_v55, 0.0  ;;  %v1935_v54 = vld [vmem:[%s3376_s3 + $0xb8] sm:$0xff]  }
  0xe9   :  { %v477_v62 = vmul.f32 0.3275911, %v2269_v58  ;;  %v479_v63 = vmul.f32 0.3275911, %v2272_v59  ;;  %v2283_v1 = vand.u32 2147483647, %v2275_v60  ;;  %v2300_v14 = vadd.f32 %v307_v9, %v2246_v48 }
  0xea   :  { %v2286_v2 = vand.u32 2147483647, %v2278_v61  ;;  %v2294_v12 = vmul.f32 0.70710677, %v2291_v7  ;;  %v2306_v16 = vmul.f32 0.70710677, %v2297_v13  ;;  %v2319_v23 = vadd.f32 %v380_v18, %v2248_v49  ;;  %v311_v26 = vpop.f32.mrf.mxu0  ;;  %v384_v32 = vpop.f32.mrf.mxu1 }
  0xeb   :  { %v509_v3 = vadd.f32 1.0, %v477_v62  ;;  %v511_v4 = vadd.f32 1.0, %v479_v63  ;;  %v478_v5 = vmul.f32 0.3275911, %v2283_v1  ;;  %v2309_v17 = vmul.f32 0.70710677, %v2300_v14 }
  0xec   :  { %v480_v6 = vmul.f32 0.3275911, %v2286_v2  ;;  %v2303_v15 = vand.u32 2147483647, %v2294_v12  ;;  %v2313_v20 = vand.u32 2147483647, %v2306_v16  ;;  %v2330_v31 = vadd.f32 %v311_v26, %v2242_v44 }
  0xed   :  { %1964 = vrcp.f32 %v509_v3  ;;  %v510_v10 = vadd.f32 1.0, %v478_v5  ;;  %v2316_v21 = vand.u32 2147483647, %v2309_v17  ;;  %v2324_v27 = vmul.f32 0.70710677, %v2319_v23 }
  0xee   :  { %1966 = vrcp.f32 %v511_v4  ;;  %v512_v11 = vadd.f32 1.0, %v480_v6  ;;  %v481_v19 = vmul.f32 0.3275911, %v2303_v15  ;;  %v483_v24 = vmul.f32 0.3275911, %v2313_v20 }
  0xef   :  { %1968 = vrcp.f32 %v510_v10  ;;  %v482_v25 = vmul.f32 0.3275911, %v2316_v21  ;;  %v2327_v30 = vand.u32 2147483647, %v2324_v27  ;;  %v2340_v38 = vmul.f32 0.70710677, %v2330_v31 }
  0xf0   :  { %1970 = vrcp.f32 %v512_v11  ;;  %v513_v22 = vadd.f32 1.0, %v481_v19  ;;  %v515_v28 = vadd.f32 1.0, %v483_v24  ;;  %v2343_v39 = vadd.f32 %v384_v32, %v2244_v45 }
  0xf1   :  { %v514_v29 = vadd.f32 1.0, %v482_v25  ;;  %v484_v36 = vmul.f32 0.3275911, %v2327_v30  ;;  %v2351_v52 = vand.u32 2147483647, %v2340_v38  ;;  %v861_v62 = vsub.f32 0.0, %v2269_v58 }
  0xf2   :  { %1972 = vrcp.f32 %v513_v22  ;;  %v2354_v53 = vmul.f32 0.70710677, %v2343_v39  ;;  %v863_v6 = vsub.f32 0.0, %v2272_v59  ;;  %vm1054_vm2 = vcmp.ge.f32.partialorder %v2275_v60, 0.0  ;;  %v1937_v60 = vld [vmem:[%s3376_s3 + $0x30] sm:$0xff]  }
  0xf3   :  { %1974 = vrcp.f32 %v515_v28  ;;  %v516_v46 = vadd.f32 1.0, %v484_v36  ;;  %v485_v10 = vmul.f32 0.3275911, %v2351_v52  ;;  %v893_v11 = vmul.f32 %v861_v62, %v2269_v58 }
  0xf4   :  { %1976 = vrcp.f32 %v514_v29  ;;  %v2361_v5 = vand.u32 2147483647, %v2354_v53  ;;  %v895_v28 = vmul.f32 %v863_v6, %v2272_v59  ;;  %v862_v29 = vsub.f32 0.0, %v2283_v1 }
  0xf5   :  { %1978 = vrcp.f32 %v516_v46  ;;  %v864_v46 = vsub.f32 0.0, %v2286_v2  ;;  %vm1056_vm3 = vcmp.ge.f32.partialorder %v2278_v61, 0.0  ;;  %vm1057_vm4 = vcmp.ge.f32.partialorder %v2294_v12, 0.0 }
  0xf6   :  { %v487_v25 = vmul.f32 0.3275911, %v2361_v5  ;;  %vm1059_vm5 = vcmp.ge.f32.partialorder %v2306_v16, 0.0  ;;  %vm1058_vm6 = vcmp.ge.f32.partialorder %v2309_v17, 0.0  ;;  %vm1060_vm7 = vcmp.ge.f32.partialorder %v2324_v27, 0.0 }
  0xf7   :  { %vm1061_vm8 = vcmp.ge.f32.partialorder %v2340_v38, 0.0  ;;  %vm1063_vm9 = vcmp.ge.f32.partialorder %v2354_v53, 0.0  ;;  %v1958_v38 = vld [vmem:[%s3376_s3 + $0xc8] sm:$0xff]  }
  0xfa   :  { %v2332_v33 = vpop.eup %1964 }
  0xfb   :  { %v2334_v34 = vpop.eup %1966  ;;  %v573_v35 = vmul.f32 1.0614054, %v2332_v33 }
  0xfc   :  { %v575_v37 = vmul.f32 1.0614054, %v2334_v34  ;;  %v2345_v40 = vpop.eup %1968 }
  0xfd   :  { %v1702_v41 = vadd.f32 -1.4531521, %v573_v35  ;;  %v574_v43 = vmul.f32 1.0614054, %v2345_v40  ;;  %v2348_v47 = vpop.eup %1970 }
  0xfe   :  { %v1704_v42 = vadd.f32 -1.4531521, %v575_v37  ;;  %v576_v0 = vmul.f32 1.0614054, %v2348_v47  ;;  %v517_v37 = vadd.f32 1.0, %v485_v10 }
  0xff   :  { %v1703_v63 = vadd.f32 -1.4531521, %v574_v43  ;;  %v637_v3 = vmul.f32 %v2332_v33, %v1702_v41  ;;  %v2364_v9 = vpop.eup %1972  ;;  %v925_v41 = vmul.f32 1.442695, %v893_v11 }
 0x100   :  { %v639_v4 = vmul.f32 %v2334_v34, %v1704_v42  ;;  %v1705_v8 = vadd.f32 -1.4531521, %v576_v0  ;;  %v577_v19 = vmul.f32 1.0614054, %v2364_v9  ;;  %v2371_v26 = vpop.eup %1974  ;;  %v2380_v42 = vmul.f32 0.5, %v2251_v50 }
 0x101   :  { %v638_v18 = vmul.f32 %v2345_v40, %v1703_v63  ;;  %v669_v22 = vadd.f32 1.4214138, %v637_v3  ;;  %v2376_v35 = vpop.eup %1976  ;;  %v579_v58 = vmul.f32 1.0614054, %v2371_v26  ;;  %v519_v0 = vadd.f32 1.0, %v487_v25 }
 0x102   :  { %v671_v24 = vadd.f32 1.4214138, %v639_v4  ;;  %v640_v32 = vmul.f32 %v2348_v47, %v1705_v8  ;;  %v1706_v36 = vadd.f32 -1.4531521, %v577_v19  ;;  %v578_v63 = vmul.f32 1.0614054, %v2376_v35 }
 0x103   :  { %v670_v43 = vadd.f32 1.4214138, %v638_v18  ;;  %v701_v62 = vmul.f32 %v2332_v33, %v669_v22  ;;  %v929_v3 = vmul.f32 1.442695, %v895_v28  ;;  %v894_v4 = vmul.f32 %v862_v29, %v2283_v1 }
 0x104   :  { %v703_v59 = vmul.f32 %v2334_v34, %v671_v24  ;;  %v672_v6 = vadd.f32 1.4214138, %v640_v32  ;;  %v1708_v8 = vadd.f32 -1.4531521, %v579_v58  ;;  %v641_v10 = vmul.f32 %v2364_v9, %v1706_v36  ;;  %v2397_v36 = vpop.eup %1978 }
 0x105   :  { %v865_v50 = vsub.f32 0.0, %v2303_v15  ;;  %v1707_v11 = vadd.f32 -1.4531521, %v578_v63  ;;  %1980 = vrcp.f32 %v517_v37  ;;  %v2390_v18 = vmul.f32 0.5, %v2254_v51 }
 0x106   :  { %1982 = vpow2.f32 %v925_v41  ;;  %v702_v19 = vmul.f32 %v2345_v40, %v670_v43  ;;  %v896_v22 = vmul.f32 %v864_v46, %v2286_v2  ;;  %v1734_v24 = vadd.f32 -0.28449672, %v701_v62 }
 0x107   :  { %v1736_v25 = vadd.f32 -0.28449672, %v703_v59  ;;  %v867_v1 = vsub.f32 0.0, %v2313_v20  ;;  %1984 = vrcp.f32 %v519_v0  ;;  %v927_v28 = vmul.f32 1.442695, %v894_v4 }
 0x108   :  { %1986 = vpow2.f32 %v929_v3  ;;  %v704_v29 = vmul.f32 %v2348_v47, %v672_v6  ;;  %v643_v32 = vmul.f32 %v2371_v26, %v1708_v8  ;;  %v673_v58 = vadd.f32 1.4214138, %v641_v10 }
 0x109   :  { %v897_v51 = vmul.f32 %v865_v50, %v2303_v15  ;;  %v642_v37 = vmul.f32 %v2376_v35, %v1707_v11  ;;  %v866_v2 = vsub.f32 0.0, %v2316_v21  ;;  %v1735_v41 = vadd.f32 -0.28449672, %v702_v19 }
 0x10a   :  { %v2403_v43 = vmul.f32 0.5, %v2263_v56  ;;  %v931_v46 = vmul.f32 1.442695, %v896_v22  ;;  %v2406_v62 = vmul.f32 0.5, %v2266_v57  ;;  %v765_v59 = vmul.f32 %v2332_v33, %v1734_v24  ;;  %v313_v24 = vpop.f32.mrf.mxu0 }
 0x10b   :  { %v767_v63 = vmul.f32 %v2334_v34, %v1736_v25  ;;  %v2411_v0 = vmul.f32 0.5, %v2291_v7  ;;  %v899_v15 = vmul.f32 %v867_v1, %v2313_v20  ;;  %1988 = vpow2.f32 %v927_v28 }
 0x10c   :  { %v1737_v3 = vadd.f32 -0.28449672, %v704_v29  ;;  %v675_v4 = vadd.f32 1.4214138, %v643_v32  ;;  %v580_v6 = vmul.f32 1.0614054, %v2397_v36  ;;  %v705_v56 = vmul.f32 %v2364_v9, %v673_v58 }
 0x10d   :  { %v933_v8 = vmul.f32 1.442695, %v897_v51  ;;  %v674_v10 = vadd.f32 1.4214138, %v642_v37  ;;  %v898_v57 = vmul.f32 %v866_v2, %v2316_v21  ;;  %v766_v50 = vmul.f32 %v2345_v40, %v1735_v41 }
 0x10e   :  { %1990 = vpow2.f32 %v931_v46  ;;  %v2419_v11 = vmul.f32 0.5, %v2297_v13  ;;  %v2422_v7 = vmul.f32 0.5, %v2300_v14  ;;  %v797_v20 = vadd.f32 0.2548296, %v765_v59 }
 0x10f   :  { %v799_v19 = vadd.f32 0.2548296, %v767_v63  ;;  %v937_v22 = vmul.f32 1.442695, %v899_v15  ;;  %v768_v25 = vmul.f32 %v2348_v47, %v1737_v3  ;;  %v707_v1 = vmul.f32 %v2371_v26, %v675_v4 }
 0x110   :  { %v1709_v28 = vadd.f32 -1.4531521, %v580_v6  ;;  %v2427_v21 = vmul.f32 0.5, %v2319_v23  ;;  %v1738_v29 = vadd.f32 -0.28449672, %v705_v56  ;;  %1992 = vpow2.f32 %v933_v8 }
 0x111   :  { %v706_v13 = vmul.f32 %v2376_v35, %v674_v10  ;;  %v935_v32 = vmul.f32 1.442695, %v898_v57  ;;  %v798_v14 = vadd.f32 0.2548296, %v766_v50  ;;  %v868_v51 = vsub.f32 0.0, %v2327_v30 }
 0x112   :  { %v2430_v58 = vpop.eup %1980  ;;  %v869_v37 = vsub.f32 0.0, %v2351_v52  ;;  %v2435_v2 = vadd.f32 %v313_v24, %v2246_v48  ;;  %v829_v46 = vmul.f32 %v2332_v33, %v797_v20  ;;  %v831_v23 = vmul.f32 %v2334_v34, %v799_v19 }
 0x113   :  { %v1983_v41 = vpop.eup %1982  ;;  %1994 = vpow2.f32 %v937_v22  ;;  %v871_v59 = vsub.f32 0.0, %v2361_v5  ;;  %v800_v15 = vadd.f32 0.2548296, %v768_v25  ;;  %v1740_v3 = vadd.f32 -0.28449672, %v707_v1 }
 0x114   :  { %v2440_v63 = vpop.eup %1984  ;;  %v644_v4 = vmul.f32 %v2397_v36, %v1709_v28  ;;  %v2444_v6 = vmul.f32 0.5, %v2330_v31  ;;  %v769_v8 = vmul.f32 %v2364_v9, %v1738_v29  ;;  %v1739_v10 = vadd.f32 -0.28449672, %v706_v13 }
 0x115   :  { %v1987_v56 = vpop.eup %1986  ;;  %1996 = vpow2.f32 %v935_v32  ;;  %v581_v33 = vmul.f32 1.0614054, %v2430_v58  ;;  %v830_v34 = vmul.f32 %v2345_v40, %v798_v14  ;;  %v900_v57 = vmul.f32 %v868_v51, %v2327_v30  ;;  %v386_v14 = vpop.f32.mrf.mxu1 }
 0x116   :  { %v901_v50 = vmul.f32 %v869_v37, %v2351_v52  ;;  %v2452_v20 = vmul.f32 0.70710677, %v2435_v2  ;;  %v2454_v19 = vmul.f32 %v1983_v41, %v829_v46  ;;  %v2456_v31 = vmul.f32 %v1987_v56, %v831_v23 }
 0x117   :  { %v583_v22 = vmul.f32 1.0614054, %v2440_v63  ;;  %v903_v24 = vmul.f32 %v871_v59, %v2361_v5  ;;  %v832_v25 = vmul.f32 %v2348_v47, %v800_v15  ;;  %v771_v1 = vmul.f32 %v2371_v26, %v1740_v3 }
 0x118   :  { %3423 = vst [vmem:[#allocation4_spill] sm:$0xff] %v2452_v20  ;;  %v676_v40 = vadd.f32 1.4214138, %v644_v4  ;;  %v2463_v30 = vand.u32 2147483647, %v2452_v20  ;;  %v1989_v52 = vpop.eup %1988  ;;  %v770_v29 = vmul.f32 %v2376_v35, %v1739_v10  ;;  %v2467_v32 = vmul.f32 0.5, %v2343_v39 }
 0x119   :  { %v801_v28 = vadd.f32 0.2548296, %v769_v8  ;;  %v1710_v13 = vadd.f32 -1.4531521, %v581_v33  ;;  %v2471_v47 = vmul.f32 %v1989_v52, %v830_v34  ;;  %v939_v5 = vmul.f32 1.442695, %v900_v57 }
 0x11a   :  { %v2473_v51 = vmul.f32 1.442695, %v901_v50  ;;  %v486_v37 = vmul.f32 0.3275911, %v2463_v30  ;;  %v1021_v46 = vsub.f32 1.0, %v2454_v19  ;;  %v1023_v23 = vsub.f32 1.0, %v2456_v31  ;;  %v315_v19 = vpop.f32.mrf.mxu0  ;;  %v388_v31 = vpop.f32.mrf.mxu1 }
 0x11b   :  { %v1991_v41 = vpop.eup %1990  ;;  %v1712_v59 = vadd.f32 -1.4531521, %v583_v22  ;;  %v2478_v39 = vmul.f32 1.442695, %v903_v24  ;;  %v803_v3 = vadd.f32 0.2548296, %v771_v1  ;;  %v708_v4 = vmul.f32 %v2397_v36, %v676_v40 }
 0x11c   :  { %v2480_v15 = vmul.f32 %v1991_v41, %v832_v25  ;;  %v2484_v56 = vadd.f32 %v386_v14, %v2248_v49  ;;  %v833_v8 = vmul.f32 %v2364_v9, %v801_v28  ;;  %v802_v10 = vadd.f32 0.2548296, %v770_v29  ;;  %v1932_v22 = vld [vmem:[%s3376_s3 + $0x78] sm:$0xff]  }
 0x11d   :  { %v645_v33 = vmul.f32 %v2430_v58, %v1710_v13  ;;  %v518_v34 = vadd.f32 1.0, %v486_v37  ;;  %v1993_v57 = vpop.eup %1992  ;;  %v1022_v50 = vsub.f32 1.0, %v2471_v47  ;;  %v1085_v24 = vsub.f32 0.0, %v1021_v46  ;;  %v1933_v9 = vld [vmem:[%s3376_s3 + $0x38] sm:$0xff]   ;;  %1799 = vmatprep.subr.bf16.mxu0 %v1932_v22 }
 0x11e   :  { %v1087_v25 = vsub.f32 0.0, %v1023_v23  ;;  %v647_v1 = vmul.f32 %v2440_v63, %v1712_v59  ;;  %v1024_v52 = vsub.f32 1.0, %v2480_v15  ;;  %v835_v28 = vmul.f32 %v2371_v26, %v803_v3  ;;  %1800 = vmatpush3.bf16.msra.mxu0 %v1933_v9  ;;  %v1934_v3 = vld [vmem:[%s3376_s3 + $0xf8] sm:$0xff]  }
 0x11f   :  { %1998 = vrcp.f32 %v518_v34  ;;  %v1741_v29 = vadd.f32 -0.28449672, %v708_v4  ;;  %v2501_v13 = vmul.f32 0.70710677, %v2484_v56  ;;  %v2503_v14 = vmul.f32 %v1993_v57, %v833_v8  ;;  %1839 = vmatprep.subr.bf16.mxu1 %v1934_v3 }
 0x120   :  { %v1995_v40 = vpop.eup %1994  ;;  %v677_v47 = vadd.f32 1.4214138, %v645_v33  ;;  %v2506_v37 = vadd.f32 %v315_v19, %v2242_v44  ;;  %v2509_v41 = vadd.f32 %v388_v31, %v2244_v45  ;;  %v1086_v34 = vsub.f32 0.0, %v1022_v50  ;;  %1840 = vmatpush3.bf16.msra.mxu1 %v1935_v54 }
 0x121   :  { %3424 = vst [vmem:[#allocation5_spill] sm:$0xff] %v2501_v13  ;;  %v834_v15 = vmul.f32 %v2376_v35, %v802_v10  ;;  %v2513_v26 = vand.u32 2147483647, %v2501_v13  ;;  %v1117_v4 = vsel %vm1053_vm0, %v1021_v46, %v1085_v24  ;;  %v1119_v8 = vsel %vm1055_vm1, %v1023_v23, %v1087_v25  ;;  %v1936_v23 = vld [vmem:[%s3376_s3 + $0x70] sm:$0xff]  }
 0x122   :  { %v1997_v59 = vpop.eup %1996  ;;  %v679_v33 = vadd.f32 1.4214138, %v647_v1  ;;  %v2523_v57 = vmul.f32 0.70710677, %v2506_v37  ;;  %v1088_v19 = vsub.f32 0.0, %v1024_v52  ;;  %v2525_v31 = vmul.f32 %v1995_v40, %v835_v28  ;;  %1801 = vmatprep.subr.bf16.mxu0 %v1936_v23 }
 0x123   :  { %v488_v35 = vmul.f32 0.3275911, %v2513_v26  ;;  %v2529_v10 = vmul.f32 0.70710677, %v2509_v41  ;;  %v1025_v55 = vsub.f32 1.0, %v2503_v14  ;;  %2000 = vpow2.f32 %v939_v5  ;;  %1802 = vmatpush3.bf16.msra.mxu0 %v1937_v60 }
 0x124   :  { %3425 = vst [vmem:[#allocation6_spill] sm:$0xff] %v2523_v57  ;;  %v2537_v46 = vand.u32 2147483647, %v2523_v57  ;;  %v1118_v22 = vsel %vm1054_vm2, %v1022_v50, %v1086_v34  ;;  %v2544_v24 = vmul.f32 %v1997_v59, %v834_v15  ;;  %v2549_v9 = vadd.f32 1.0, %v1117_v4  ;;  %v317_v34 = vpop.f32.mrf.mxu0  ;;  %v390_v4 = vpop.f32.mrf.mxu1 }
 0x125   :  { %3426 = vst [vmem:[#allocation7_spill] sm:$0xff] %v2529_v10  ;;  %v520_v25 = vadd.f32 1.0, %v488_v35  ;;  %v2547_v1 = vand.u32 2147483647, %v2529_v10  ;;  %v2551_v5 = vadd.f32 1.0, %v1119_v8  ;;  %v772_v40 = vmul.f32 %v2397_v36, %v1741_v29  ;;  %v1938_v29 = vld [vmem:[%s3376_s3 + $0xf0] sm:$0xff]  }
 0x126   :  { %v489_v28 = vmul.f32 0.3275911, %v2537_v46  ;;  %v1120_v50 = vsel %vm1056_vm3, %v1024_v52, %v1088_v19  ;;  %v1027_v14 = vsub.f32 1.0, %v2525_v31  ;;  %v2566_v15 = vadd.f32 1.0, %v1118_v22  ;;  %v1939_v8 = vld [vmem:[%s3376_s3 + $0xb0] sm:$0xff]   ;;  %1841 = vmatprep.subr.bf16.mxu1 %v1938_v29 }
 0x127   :  { %2002 = vrcp.f32 %v520_v25  ;;  %v491_v59 = vmul.f32 0.3275911, %v2547_v1  ;;  %v1089_v3 = vsub.f32 0.0, %v1025_v55  ;;  %v709_v61 = vmul.f32 %v2430_v58, %v677_v47  ;;  %1842 = vmatpush3.bf16.msra.mxu1 %v1939_v8  ;;  %v1940_v47 = vld [vmem:[%s3376_s3 + $0x68] sm:$0xff]  }
 0x128   :  { %v521_v52 = vadd.f32 1.0, %v489_v28  ;;  %v1026_v19 = vsub.f32 1.0, %v2544_v24  ;;  %v711_v31 = vmul.f32 %v2440_v63, %v679_v33  ;;  %v2575_v54 = vadd.f32 1.0, %v1120_v50  ;;  %v321_v24 = vpop.f32.mrf.mxu0  ;;  %v1941_v33 = vld [vmem:[%s3376_s3 + $0x28] sm:$0xff]   ;;  %v394_v50 = vpop.f32.mrf.mxu1  ;;  %1803 = vmatprep.subr.bf16.mxu0 %v1940_v47  ;;  %v1944_v47 = vld [vmem:[%s3376_s3 + $0x60] sm:$0xff]  }
 0x129   :  { %v523_v35 = vadd.f32 1.0, %v491_v59  ;;  %v804_v23 = vadd.f32 0.2548296, %v772_v40  ;;  %v1091_v25 = vsub.f32 0.0, %v1027_v14  ;;  %v2583_v28 = vadd.f32 %v317_v34, %v2246_v48  ;;  %1804 = vmatpush3.bf16.msra.mxu0 %v1941_v33 }
 0x12a   :  { %2004 = vrcp.f32 %v521_v52  ;;  %v1742_v60 = vadd.f32 -0.28449672, %v709_v61  ;;  %v2590_v40 = vadd.f32 %v390_v4, %v2248_v49  ;;  %v1121_v59 = vsel %vm1057_vm4, %v1025_v55, %v1089_v3  ;;  %v1942_v61 = vld [vmem:[%s3376_s3 + $0xe8] sm:$0xff]   ;;  %1805 = vmatprep.subr.bf16.mxu0 %v1944_v47 }
 0x12b   :  { %2006 = vrcp.f32 %v523_v35  ;;  %v1090_v29 = vsub.f32 0.0, %v1026_v19  ;;  %v1744_v52 = vadd.f32 -0.28449672, %v711_v31  ;;  %v2595_v34 = vmul.f32 0.70710677, %v2583_v28  ;;  %v1943_v55 = vld [vmem:[%s3376_s3 + $0xa8] sm:$0xff]   ;;  %1843 = vmatprep.subr.bf16.mxu1 %v1942_v61 }
 0x12c   :  { %v2580_v22 = vpop.eup %1998  ;;  %2008 = vpow2.f32 %v2473_v51  ;;  %v870_v4 = vsub.f32 0.0, %v2463_v30  ;;  %v2603_v8 = vmul.f32 0.70710677, %v2590_v40  ;;  %v2606_v12 = vadd.f32 %v321_v24, %v2242_v44  ;;  %1844 = vmatpush3.bf16.msra.mxu1 %v1943_v55 }
 0x12d   :  { %3427 = vst [vmem:[#allocation8_spill] sm:$0xff] %v2595_v34  ;;  %v582_v51 = vmul.f32 1.0614054, %v2580_v22  ;;  %v836_v3 = vmul.f32 %v2397_v36, %v804_v23  ;;  %2010 = vpow2.f32 %v2478_v39  ;;  %v2614_v31 = vand.u32 2147483647, %v2595_v34  ;;  %v1945_v23 = vld [vmem:[%s3376_s3 + $0x20] sm:$0xff]  }
 0x12e   :  { %3428 = vst [vmem:[#allocation9_spill] sm:$0xff] %v2603_v8  ;;  %3429 = vst [vmem:[#allocation10_spill] sm:$0xff] %v2606_v12  ;;  %v2617_v35 = vadd.f32 %v394_v50, %v2244_v45  ;;  %v2622_v24 = vadd.f32 1.0, %v1121_v59  ;;  %v1123_v33 = vsel %vm1059_vm5, %v1027_v14, %v1091_v25  ;;  %v2627_v36 = vand.u32 2147483647, %v2603_v8  ;;  %1806 = vmatpush3.bf16.msra.mxu0 %v1945_v23 }
 0x12f   :  { %v2630_v39 = vmul.f32 0.70710677, %v2606_v12  ;;  %v1122_v61 = vsel %vm1058_vm6, %v1026_v19, %v1090_v29  ;;  %v773_v59 = vmul.f32 %v2430_v58, %v1742_v60  ;;  %v775_v16 = vmul.f32 %v2440_v63, %v1744_v52  ;;  %v1946_v29 = vld [vmem:[%s3376_s3 + $0xe0] sm:$0xff]  }
 0x130   :  { %3430 = vst [vmem:[#allocation11_spill] sm:$0xff] %v2617_v35  ;;  %v2001_v50 = vpop.eup %2000  ;;  %v490_v14 = vmul.f32 0.3275911, %v2614_v31  ;;  %v1711_v25 = vadd.f32 -1.4531521, %v582_v51  ;;  %v902_v8 = vmul.f32 %v870_v4, %v2463_v30  ;;  %v2645_v10 = vadd.f32 1.0, %v1123_v33  ;;  %1845 = vmatprep.subr.bf16.mxu1 %v1946_v29  ;;  %v323_v29 = vpop.f32.mrf.mxu0 }
 0x131   :  { %3431 = vst [vmem:[#allocation12_spill] sm:$0xff] %v2630_v39  ;;  %v492_v55 = vmul.f32 0.3275911, %v2627_v36  ;;  %v2643_v34 = vmul.f32 0.70710677, %v2617_v35  ;;  %v2647_v17 = vmul.f32 %v2001_v50, %v836_v3  ;;  %v2657_v30 = vadd.f32 1.0, %v1122_v61 }
 0x132   :  { %v522_v19 = vadd.f32 1.0, %v490_v14  ;;  %v2650_v60 = vand.u32 2147483647, %v2630_v39  ;;  %v805_v4 = vadd.f32 0.2548296, %v773_v59  ;;  %v646_v3 = vmul.f32 %v2580_v22, %v1711_v25  ;;  %v1947_v14 = vld [vmem:[%s3376_s3 + $0xa0] sm:$0xff]  }
 0x133   :  { %3432 = vst [vmem:[#allocation13_spill] sm:$0xff] %v2643_v34  ;;  %v524_v51 = vadd.f32 1.0, %v492_v55  ;;  %v807_v47 = vadd.f32 0.2548296, %v775_v16  ;;  %v2661_v23 = vmul.f32 1.442695, %v902_v8  ;;  %1846 = vmatpush3.bf16.msra.mxu1 %v1947_v14  ;;  %v2691_v13 = vadd.f32 %v323_v29, %v2246_v48 }
 0x134   :  { %v2655_v52 = vpop.eup %2002  ;;  %2012 = vrcp.f32 %v522_v19  ;;  %v2664_v50 = vand.u32 2147483647, %v2643_v34  ;;  %v493_v55 = vmul.f32 0.3275911, %v2650_v60  ;;  %v1948_v8 = vld [vmem:[%s3376_s3 + $0x58] sm:$0xff]   ;;  %v837_v39 = vmul.f32 %v2430_v58, %v805_v4  ;;  %v1952_v48 = vld [vmem:[%s3376_s3 + $0x50] sm:$0xff]  }
 0x135   :  { %v584_v33 = vmul.f32 1.0614054, %v2655_v52  ;;  %2014 = vrcp.f32 %v524_v51  ;;  %v839_v57 = vmul.f32 %v2440_v63, %v807_v47  ;;  %v872_v51 = vsub.f32 0.0, %v2513_v26  ;;  %1807 = vmatprep.subr.bf16.mxu0 %v1948_v8  ;;  %v1949_v59 = vld [vmem:[%s3376_s3 + $0x18] sm:$0xff]   ;;  %3434 = vst [vmem:[#allocation15_spill] sm:$0xff] %v2691_v13 }
 0x136   :  { %v678_v35 = vadd.f32 1.4214138, %v646_v3  ;;  %v495_v14 = vmul.f32 0.3275911, %v2664_v50  ;;  %v873_v63 = vsub.f32 0.0, %v2537_v46  ;;  %1808 = vmatpush3.bf16.msra.mxu0 %v1949_v59  ;;  %v1950_v4 = vld [vmem:[%s3376_s3 + $0xd8] sm:$0xff]   ;;  %v2811_v53 = vmul.f32 %v2549_v9, %v2380_v42 }
 0x137   :  { %v2669_v61 = vpop.eup %2004  ;;  %v1713_v16 = vadd.f32 -1.4531521, %v584_v33  ;;  %v2682_v33 = vmul.f32 0.5, %v2435_v2  ;;  %v525_v8 = vadd.f32 1.0, %v493_v55  ;;  %v1951_v3 = vld [vmem:[%s3376_s3 + $0x98] sm:$0xff]   ;;  %1847 = vmatprep.subr.bf16.mxu1 %v1950_v4  ;;  %v3436_v55 = vsub.f32 1.0, %v2647_v17  ;;  %1809 = vmatprep.subr.bf16.mxu0 %v1952_v48 }
 0x138   :  { %v2676_v25 = vpop.eup %2006  ;;  %v585_v19 = vmul.f32 1.0614054, %v2669_v61  ;;  %v527_v59 = vadd.f32 1.0, %v495_v14  ;;  %1848 = vmatpush3.bf16.msra.mxu1 %v1951_v3  ;;  %v904_v4 = vmul.f32 %v872_v51, %v2513_v26  ;;  %v396_v3 = vpop.f32.mrf.mxu1  ;;  %3441 = vst [vmem:[#allocation20_spill] sm:$0xff] %v2811_v53 }
 0x139   :  { %v2009_v34 = vpop.eup %2008  ;;  %3433 = vst [vmem:[#allocation14_spill] sm:$0xff] %v2682_v33  ;;  %v648_v12 = vmul.f32 %v2655_v52, %v1713_v16  ;;  %v587_v2 = vmul.f32 1.0614054, %v2676_v25  ;;  %v2702_v16 = vmul.f32 0.70710677, %v2691_v13  ;;  %v1092_v20 = vsub.f32 0.0, %v3436_v55 }
 0x13a   :  { %v1714_v58 = vadd.f32 -1.4531521, %v585_v19  ;;  %v2011_v47 = vpop.eup %2010  ;;  %v2704_v29 = vmul.f32 %v2009_v34, %v837_v39  ;;  %v710_v13 = vmul.f32 %v2580_v22, %v678_v35  ;;  %v905_v34 = vmul.f32 %v873_v63, %v2537_v46 }
 0x13b   :  { %3435 = vst [vmem:[#allocation16_spill] sm:$0xff] %v2702_v16  ;;  %v2706_v19 = vmul.f32 %v2011_v47, %v839_v57  ;;  %v680_v33 = vadd.f32 1.4214138, %v648_v12  ;;  %v2718_v57 = vmul.f32 0.5, %v2484_v56  ;;  %v875_v12 = vsub.f32 0.0, %v2547_v1 }
 0x13c   :  { %v2722_v39 = vand.u32 2147483647, %v2702_v16  ;;  %v649_v14 = vmul.f32 %v2669_v61, %v1714_v58  ;;  %v1716_v47 = vadd.f32 -1.4531521, %v587_v2  ;;  %2016 = vrcp.f32 %v525_v8 }
 0x13d   :  { %3437 = vst [vmem:[#allocation17_spill] sm:$0xff] %v2718_v57  ;;  %v1029_v35 = vsub.f32 1.0, %v2704_v29  ;;  %v1031_v26 = vsub.f32 1.0, %v2706_v19  ;;  %v712_v46 = vmul.f32 %v2655_v52, %v680_v33  ;;  %2018 = vrcp.f32 %v527_v59  ;;  %v1953_v33 = vld [vmem:[%s3376_s3 + $0x10] sm:$0xff]  }
 0x13e   :  { %3438 = vst [vmem:[#allocation18_spill] sm:$0xff] %v2722_v39  ;;  %v1743_v51 = vadd.f32 -0.28449672, %v710_v13  ;;  %v947_v63 = vmul.f32 1.442695, %v904_v4  ;;  %v874_v58 = vsub.f32 0.0, %v2614_v31  ;;  %v2738_v8 = vadd.f32 %v396_v3, %v2248_v49  ;;  %1810 = vmatpush3.bf16.msra.mxu0 %v1953_v33 }
 0x13f   :  { %v2731_v55 = vmul.f32 1.442695, %v905_v34  ;;  %v494_v2 = vmul.f32 0.3275911, %v2722_v39  ;;  %v681_v29 = vadd.f32 1.4214138, %v649_v14  ;;  %v651_v13 = vmul.f32 %v2676_v25, %v1716_v47 }
 0x140   :  { %3439 = vst [vmem:[#allocation19_spill] sm:$0xff] %v2738_v8  ;;  %v907_v19 = vmul.f32 %v875_v12, %v2547_v1  ;;  %v876_v59 = vsub.f32 0.0, %v2627_v36  ;;  %v1954_v4 = vld [vmem:[%s3376_s3 + $0xd0] sm:$0xff]   ;;  %v1745_v34 = vadd.f32 -0.28449672, %v712_v46  ;;  %2020 = vpow2.f32 %v2661_v23 }
 0x141   :  { %v2728_v56 = vpop.eup %2012  ;;  %1849 = vmatprep.subr.bf16.mxu1 %v1954_v4  ;;  %v3440_v14 = vsub.f32 1.0, %v2647_v17  ;;  %v1093_v12 = vsub.f32 0.0, %v1029_v35  ;;  %v526_v47 = vadd.f32 1.0, %v494_v2  ;;  %v2758_v57 = vmul.f32 0.70710677, %v2738_v8  ;;  %v1955_v23 = vld [vmem:[%s3376_s3 + $0x90] sm:$0xff]  }
 0x142   :  { %v2733_v48 = vpop.eup %2014  ;;  %v586_v3 = vmul.f32 1.0614054, %v2728_v56  ;;  %v1095_v49 = vsub.f32 0.0, %v1031_v26  ;;  %v774_v46 = vmul.f32 %v2580_v22, %v1743_v51  ;;  %v683_v39 = vadd.f32 1.4214138, %v651_v13  ;;  %1850 = vmatpush3.bf16.msra.mxu1 %v1955_v23  ;;  %v1956_v51 = vld [vmem:[%s3376_s3 + $0x48] sm:$0xff]  }
 0x143   :  { %v588_v16 = vmul.f32 1.0614054, %v2733_v48  ;;  %v1124_v1 = vsel %vm1060_vm7, %v3440_v14, %v1092_v20  ;;  %v2761_v33 = vmul.f32 1.442695, %v907_v19  ;;  %v713_v17 = vmul.f32 %v2669_v61, %v681_v29  ;;  %1811 = vmatprep.subr.bf16.mxu0 %v1956_v51  ;;  %1851 = vmatprep.subr.bf16.mxu1 %v1958_v38  ;;  %v1961_v51 = vld [vmem:[%s3376_s3] sm:$0xff]  }
 0x144   :  { %v1715_v4 = vadd.f32 -1.4531521, %v586_v3  ;;  %v906_v27 = vmul.f32 %v874_v58, %v2614_v31  ;;  %v908_v20 = vmul.f32 %v876_v59, %v2627_v36  ;;  %v2769_v2 = vadd.f32 1.0, %v1124_v1  ;;  %v1957_v36 = vld [vmem:[%s3376_s3 + $0x8] sm:$0xff]   ;;  %v1962_v38 = vld [vmem:[%s3376_s3 + $0xc0] sm:$0xff]  }
 0x145   :  { %v776_v14 = vmul.f32 %v2655_v52, %v1745_v34  ;;  %v1717_v8 = vadd.f32 -1.4531521, %v588_v16  ;;  %v1125_v13 = vsel %vm1061_vm8, %v1029_v35, %v1093_v12  ;;  %v2778_v29 = vmul.f32 0.5, %v2506_v37  ;;  %1812 = vmatpush3.bf16.msra.mxu0 %v1957_v36 }
 0x146   :  { %2022 = vrcp.f32 %v526_v47  ;;  %v2781_v31 = vand.u32 2147483647, %v2758_v57  ;;  %v806_v16 = vadd.f32 0.2548296, %v774_v46  ;;  %v715_v58 = vmul.f32 %v2676_v25, %v683_v39 }
 0x147   :  { %2024 = vpow2.f32 %v947_v63  ;;  %v2788_v19 = vmul.f32 0.5, %v2509_v41  ;;  %v1127_v35 = vsel %vm1063_vm9, %v1031_v26, %v1095_v49  ;;  %v1746_v59 = vadd.f32 -0.28449672, %v713_v17  ;;  %v1959_v49 = vld [vmem:[%s3376_s3 + $0x88] sm:$0xff]  }
 0x148   :  { %v2797_v34 = vmul.f32 1.442695, %v906_v27  ;;  %v2799_v3 = vmul.f32 1.442695, %v908_v20  ;;  %v808_v41 = vadd.f32 0.2548296, %v776_v14  ;;  %v650_v63 = vmul.f32 %v2728_v56, %v1715_v4  ;;  %v325_v4 = vpop.f32.mrf.mxu0  ;;  %1852 = vmatpush3.bf16.msra.mxu1 %v1959_v49 }
 0x149   :  { %v2793_v37 = vpop.eup %2016  ;;  %v877_v1 = vsub.f32 0.0, %v2650_v60  ;;  %v496_v12 = vmul.f32 0.3275911, %v2781_v31  ;;  %v652_v26 = vmul.f32 %v2733_v48, %v1717_v8  ;;  %v2816_v47 = vmul.f32 %v2551_v5, %v2390_v18  ;;  %v1960_v27 = vld [vmem:[%s3376_s3 + $0x40] sm:$0xff]   ;;  %1853 = vmatprep.subr.bf16.mxu1 %v1962_v38 }
 0x14a   :  { %v2801_v39 = vpop.eup %2018  ;;  %v1189_v46 = vadd.f32 1.0, %v1125_v13  ;;  %v838_v23 = vmul.f32 %v2580_v22, %v806_v16  ;;  %v1748_v17 = vadd.f32 -0.28449672, %v715_v58  ;;  %v1191_v20 = vadd.f32 1.0, %v1127_v35  ;;  %1813 = vmatprep.subr.bf16.mxu0 %v1960_v27 }
 0x14b   :  { %3442 = vst [vmem:[#allocation21_spill] sm:$0xff] %v2816_v47  ;;  %v589_v42 = vmul.f32 1.0614054, %v2793_v37  ;;  %v591_v9 = vmul.f32 1.0614054, %v2801_v39  ;;  %v528_v8 = vadd.f32 1.0, %v496_v12  ;;  %v2826_v18 = vmul.f32 %v2622_v24, %v2411_v0  ;;  %1814 = vmatpush3.bf16.msra.mxu0 %v1961_v51 }
 0x14c   :  { %v682_v5 = vadd.f32 1.4214138, %v650_v63  ;;  %v2829_v22 = vmul.f32 0.5, %v2583_v28  ;;  %v909_v14 = vmul.f32 %v877_v1, %v2650_v60  ;;  %v2837_v36 = vmul.f32 %v2645_v10, %v2419_v11  ;;  %v398_v28 = vpop.f32.mrf.mxu1 }
 0x14d   :  { %3443 = vst [vmem:[#allocation22_spill] sm:$0xff] %v2826_v18  ;;  %v2021_v13 = vpop.eup %2020  ;;  %2026 = vpow2.f32 %v2731_v55  ;;  %v684_v0 = vadd.f32 1.4214138, %v652_v26  ;;  %v2841_v24 = vadd.f32 %v325_v4, %v2242_v44  ;;  %v2845_v60 = vmul.f32 %v2566_v15, %v2403_v43 }
 0x14e   :  { %3444 = vst [vmem:[#allocation23_spill] sm:$0xff] %v2837_v36  ;;  %v2849_v16 = vmul.f32 %v2575_v54, %v2406_v62  ;;  %v2851_v58 = vmul.f32 %v2021_v13, %v838_v23  ;;  %2028 = vrcp.f32 %v528_v8  ;;  %v777_v11 = vmul.f32 %v2669_v61, %v1746_v59 }
 0x14f   :  { %2030 = vpow2.f32 %v2761_v33  ;;  %v1718_v10 = vadd.f32 -1.4531521, %v589_v42  ;;  %v1720_v55 = vadd.f32 -1.4531521, %v591_v9  ;;  %v840_v43 = vmul.f32 %v2655_v52, %v808_v41  ;;  %v1963_v52 = vld [vmem:[%s3376_s3 + $0x80] sm:$0xff]   ;;  %v3458_v33 = vld [vmem:[#allocation3_spill] sm:$0xff] }
 0x150   :  { %3445 = vst [vmem:[#allocation24_spill] sm:$0xff] %v2849_v16  ;;  %v779_v15 = vmul.f32 %v2676_v25, %v1748_v17  ;;  %v957_v62 = vmul.f32 1.442695, %v909_v14  ;;  %v2861_v54 = vadd.f32 %v398_v28, %v2244_v45  ;;  %v2868_v59 = vmul.f32 0.5, %v2590_v40  ;;  %1854 = vmatpush3.bf16.msra.mxu1 %v1963_v52  ;;  %v3450_v28 = vld [vmem:[#allocation4_spill] sm:$0xff] }
 0x151   :  { %v2871_v63 = vmul.f32 0.70710677, %v2841_v24  ;;  %v1030_v1 = vsub.f32 1.0, %v2851_v58  ;;  %v714_v12 = vmul.f32 %v2728_v56, %v682_v5  ;;  %v716_v49 = vmul.f32 %v2733_v48, %v684_v0 }
 0x152   :  { %v879_v26 = vsub.f32 0.0, %v2664_v50  ;;  %v809_v23 = vadd.f32 0.2548296, %v777_v11  ;;  %v653_v17 = vmul.f32 %v2793_v37, %v1718_v10  ;;  %v655_v4 = vmul.f32 %v2801_v39, %v1720_v55 }
 0x153   :  { %v2876_v41 = vpop.eup %2022  ;;  %v2885_v27 = vand.u32 2147483647, %v2871_v63  ;;  %v2889_v42 = vmul.f32 %v2657_v30, %v2422_v7  ;;  %v811_v8 = vadd.f32 0.2548296, %v779_v15  ;;  %v2892_v5 = vmul.f32 0.70710677, %v2861_v54 }
 0x154   :  { %v2025_v40 = vpop.eup %2024  ;;  %v2896_v14 = vmul.f32 %v2769_v2, %v2427_v21  ;;  %v2899_v51 = vmul.f32 %v1189_v46, %v2444_v6  ;;  %v2902_v13 = vmul.f32 %v1191_v20, %v2467_v32  ;;  %v590_v0 = vmul.f32 1.0614054, %v2876_v41  ;;  %v3451_v32 = vld [vmem:[#allocation5_spill] sm:$0xff]  ;;  %v3452_v15 = vld [vmem:[#allocation10_spill] sm:$0xff] }
 0x155   :  { %3446 = vst [vmem:[#allocation25_spill] sm:$0xff] %v2889_v42  ;;  %v1000_v9 = vmul.f32 %v2025_v40, %v840_v43  ;;  %vm1062_vm10 = vcmp.ge.f32.partialorder %v3450_v28, 0.0  ;;  %v1747_v7 = vadd.f32 -0.28449672, %v714_v12  ;;  %2032 = vpow2.f32 %v2797_v34  ;;  %v3454_v12 = vld [vmem:[#allocation11_spill] sm:$0xff]  ;;  %v327_v40 = vpop.f32.mrf.mxu0 }
 0x156   :  { %3447 = vst [vmem:[#allocation26_spill] sm:$0xff] %v2896_v14  ;;  %3448 = vst [vmem:[#allocation27_spill] sm:$0xff] %v2899_v51  ;;  %v1749_v30 = vadd.f32 -0.28449672, %v716_v49  ;;  %v497_v58 = vmul.f32 0.3275911, %v2885_v27  ;;  %2034 = vpow2.f32 %v2799_v3  ;;  %v841_v20 = vmul.f32 %v2669_v61, %v809_v23  ;;  %v400_v23 = vpop.f32.mrf.mxu1 }
 0x157   :  { %3449 = vst [vmem:[#allocation28_spill] sm:$0xff] %v2902_v13  ;;  %v685_v21 = vadd.f32 1.4214138, %v653_v17  ;;  %v687_v2 = vadd.f32 1.4214138, %v655_v4  ;;  %v1032_v46 = vsub.f32 1.0, %v1000_v9  ;;  %v911_v11 = vmul.f32 %v879_v26, %v2664_v50 }
 0x158   :  { %v2910_v6 = vand.u32 2147483647, %v2892_v5  ;;  %vm1064_vm11 = vcmp.ge.f32.partialorder %v3451_v32, 0.0  ;;  %v529_v10 = vadd.f32 1.0, %v497_v58  ;;  %v843_v34 = vmul.f32 %v2676_v25, %v811_v8 }
 0x159   :  { %2036 = vpow2.f32 %v957_v62  ;;  %v1719_v55 = vadd.f32 -1.4531521, %v590_v0  ;;  %v778_v43 = vmul.f32 %v2728_v56, %v1747_v7  ;;  %v2919_v52 = vmul.f32 0.5, %v3452_v15  ;;  %v3456_v0 = vld [vmem:[#allocation18_spill] sm:$0xff] }
 0x15a   :  { %v499_v38 = vmul.f32 0.3275911, %v2910_v6  ;;  %v2027_v3 = vpop.eup %2026  ;;  %v2922_v49 = vmul.f32 0.5, %v3454_v12  ;;  %2038 = vrcp.f32 %v529_v10  ;;  %v1094_v50 = vsub.f32 0.0, %v1030_v1 }
 0x15b   :  { %3453 = vst [vmem:[#allocation4_spill] sm:$0xff] %v2919_v52  ;;  %v2924_v61 = vpop.eup %2028  ;;  %v717_v26 = vmul.f32 %v2793_v37, %v685_v21  ;;  %v719_v25 = vmul.f32 %v2801_v39, %v687_v2  ;;  %v1096_v4 = vsub.f32 0.0, %v1032_v46  ;;  %v1001_v9 = vmul.f32 %v2027_v3, %v841_v20  ;;  %v3457_v2 = vld [vmem:[#allocation2_spill] sm:$0xff] }
 0x15c   :  { %3455 = vst [vmem:[#allocation5_spill] sm:$0xff] %v2922_v49  ;;  %v531_v62 = vadd.f32 1.0, %v499_v38  ;;  %v2031_v17 = vpop.eup %2030  ;;  %v961_v8 = vmul.f32 1.442695, %v911_v11  ;;  %v878_v7 = vsub.f32 0.0, %v3456_v0  ;;  %v780_v10 = vmul.f32 %v2733_v48, %v1749_v30  ;;  %v3459_v11 = vld [vmem:[#allocation6_spill] sm:$0xff] }
 0x15d   :  { %v2929_v58 = vmul.f32 %v2031_v17, %v843_v34  ;;  %v654_v15 = vmul.f32 %v2876_v41, %v1719_v55  ;;  %v810_v12 = vadd.f32 0.2548296, %v778_v43  ;;  %v592_v21 = vmul.f32 1.0614054, %v2924_v61  ;;  %v3460_v30 = vld [vmem:[#allocation15_spill] sm:$0xff] }
 0x15e   :  { %2040 = vrcp.f32 %v531_v62  ;;  %v2935_v38 = vadd.f32 %v327_v40, %v3457_v2  ;;  %v2938_v35 = vadd.f32 %v400_v23, %v3458_v33  ;;  %v1126_v20 = vsel %vm1062_vm10, %v1030_v1, %v1094_v50  ;;  %v3461_v1 = vld [vmem:[#allocation7_spill] sm:$0xff] }
 0x15f   :  { %vm1065_vm12 = vcmp.ge.f32.partialorder %v3459_v11, 0.0  ;;  %v1750_v34 = vadd.f32 -0.28449672, %v717_v26  ;;  %v1752_v3 = vadd.f32 -0.28449672, %v719_v25  ;;  %v2944_v17 = vmul.f32 0.5, %v3460_v30 }
 0x160   :  { %v1033_v55 = vsub.f32 1.0, %v1001_v9  ;;  %v910_v43 = vmul.f32 %v878_v7, %v3456_v0  ;;  %v2948_v62 = vmul.f32 0.70710677, %v2935_v38  ;;  %v2951_v40 = vmul.f32 0.70710677, %v2938_v35 }
 0x161   :  { %v1128_v28 = vsel %vm1064_vm11, %v1032_v46, %v1096_v4  ;;  %vm1067_vm13 = vcmp.ge.f32.partialorder %v3461_v1, 0.0  ;;  %v812_v50 = vadd.f32 0.2548296, %v780_v10  ;;  %2042 = vpow2.f32 %v961_v8 }
 0x162   :  { %v686_v26 = vadd.f32 1.4214138, %v654_v15  ;;  %v1035_v25 = vsub.f32 1.0, %v2929_v58  ;;  %v842_v23 = vmul.f32 %v2728_v56, %v810_v12  ;;  %v1721_v9 = vadd.f32 -1.4531521, %v592_v21  ;;  %v2033_v7 = vpop.eup %2032  ;;  %v331_v56 = vpop.f32.mrf.mxu0 }
 0x163   :  { %v2959_v0 = vand.u32 2147483647, %v2948_v62  ;;  %v1190_v30 = vadd.f32 1.0, %v1126_v20  ;;  %v781_v49 = vmul.f32 %v2793_v37, %v1750_v34  ;;  %v783_v32 = vmul.f32 %v2801_v39, %v1752_v3  ;;  %v2035_v4 = vpop.eup %2034 }
 0x164   :  { %v2964_v46 = vand.u32 2147483647, %v2951_v40  ;;  %v1192_v8 = vadd.f32 1.0, %v1128_v28  ;;  %v1097_v10 = vsub.f32 0.0, %v1033_v55  ;;  %v959_v15 = vmul.f32 1.442695, %v910_v43 }
 0x165   :  { %v498_v58 = vmul.f32 0.3275911, %v2959_v0  ;;  %v844_v12 = vmul.f32 %v2733_v48, %v812_v50  ;;  %v718_v21 = vmul.f32 %v2876_v41, %v686_v26  ;;  %v880_v20 = vsub.f32 0.0, %v2781_v31  ;;  %v3463_v50 = vld [vmem:[#allocation14_spill] sm:$0xff] }
 0x166   :  { %v500_v34 = vmul.f32 0.3275911, %v2964_v46  ;;  %v2037_v52 = vpop.eup %2036  ;;  %v1099_v3 = vsub.f32 0.0, %v1035_v25  ;;  %v2971_v13 = vmul.f32 %v2033_v7, %v842_v23  ;;  %v656_v51 = vmul.f32 %v2924_v61, %v1721_v9  ;;  %v404_v7 = vpop.f32.mrf.mxu1 }
 0x167   :  { %v530_v28 = vadd.f32 1.0, %v498_v58  ;;  %v2974_v47 = vpop.eup %2038  ;;  %v813_v43 = vadd.f32 0.2548296, %v781_v49  ;;  %v815_v36 = vadd.f32 0.2548296, %v783_v32  ;;  %v2977_v48 = vadd.f32 %v331_v56, %v2242_v44 }
 0x168   :  { %v532_v14 = vadd.f32 1.0, %v500_v34  ;;  %v2980_v26 = vmul.f32 %v1190_v30, %v3463_v50  ;;  %v1129_v16 = vsel %vm1065_vm12, %v1033_v55, %v1097_v10  ;;  %v593_v23 = vmul.f32 1.0614054, %v2974_v47  ;;  %v3465_v55 = vld [vmem:[#allocation17_spill] sm:$0xff] }
 0x169   :  { %3462 = vst [vmem:[#allocation10_spill] sm:$0xff] %v2977_v48  ;;  %2044 = vrcp.f32 %v530_v28  ;;  %v2985_v9 = vmul.f32 %v2035_v4, %v844_v12  ;;  %v1751_v58 = vadd.f32 -0.28449672, %v718_v21  ;;  %v912_v49 = vmul.f32 %v880_v20, %v2781_v31  ;;  %v333_v31 = vpop.f32.mrf.mxu0 }
 0x16a   :  { %3464 = vst [vmem:[#allocation11_spill] sm:$0xff] %v2980_v26  ;;  %2046 = vrcp.f32 %v532_v14  ;;  %v1131_v56 = vsel %vm1067_vm13, %v1035_v25, %v1099_v3  ;;  %v3410_v30 = vsub.f32 1.0, %v2971_v13  ;;  %v688_v11 = vadd.f32 1.4214138, %v656_v51 }
 0x16b   :  { %v2988_v32 = vpop.eup %2040  ;;  %2048 = vpow2.f32 %v959_v15  ;;  %v2994_v10 = vmul.f32 %v1192_v8, %v3465_v55  ;;  %v845_v34 = vmul.f32 %v2793_v37, %v813_v43  ;;  %v847_v4 = vmul.f32 %v2801_v39, %v815_v36  ;;  %v406_v15 = vpop.f32.mrf.mxu1 }
 0x16c   :  { %v2999_v12 = vmul.f32 0.70710677, %v2977_v48  ;;  %v3001_v14 = vadd.f32 1.0, %v1129_v16  ;;  %v1722_v21 = vadd.f32 -1.4531521, %v593_v23  ;;  %v881_v1 = vsub.f32 0.0, %v2885_v27 }
 0x16d   :  { %3466 = vst [vmem:[#allocation18_spill] sm:$0xff] %v2994_v10  ;;  %v595_v25 = vmul.f32 1.0614054, %v2988_v32  ;;  %v3005_v51 = vadd.f32 1.0, %v1131_v56  ;;  %v3409_v8 = vsub.f32 1.0, %v2985_v9  ;;  %v782_v37 = vmul.f32 %v2876_v41, %v1751_v58 }
 0x16e   :  { %3467 = vst [vmem:[#allocation2_spill] sm:$0xff] %v2999_v12  ;;  %v963_v20 = vmul.f32 1.442695, %v912_v49  ;;  %v2043_v39 = vpop.eup %2042  ;;  %v3011_v36 = vsub.f32 0.0, %v3410_v30  ;;  %v720_v16 = vmul.f32 %v2924_v61, %v688_v11  ;;  %v3015_v3 = vadd.f32 %v404_v7, %v2244_v45 }
 0x16f   :  { %v3018_v28 = vadd.f32 %v333_v31, %v3457_v2  ;;  %v3020_v43 = vmul.f32 %v2037_v52, %v845_v34  ;;  %v3022_v50 = vmul.f32 %v2043_v39, %v847_v4  ;;  %v3025_v23 = vand.u32 2147483647, %v2999_v12 }
 0x170   :  { %3468 = vst [vmem:[#allocation3_spill] sm:$0xff] %v3015_v3  ;;  %v3028_v58 = vadd.f32 %v406_v15, %v3458_v33  ;;  %v657_v49 = vmul.f32 %v2974_v47, %v1722_v21  ;;  %v913_v56 = vmul.f32 %v881_v1, %v2885_v27  ;;  %v1724_v11 = vadd.f32 -1.4531521, %v595_v25  ;;  %v335_v21 = vpop.f32.mrf.mxu0 }
 0x171   :  { %3469 = vst [vmem:[#allocation6_spill] sm:$0xff] %v3018_v28  ;;  %v3033_v7 = vmul.f32 0.70710677, %v3018_v28  ;;  %v3037_v52 = vsub.f32 0.0, %v3409_v8  ;;  %v814_v55 = vadd.f32 0.2548296, %v782_v37  ;;  %2050 = vpow2.f32 %v963_v20 }
 0x172   :  { %3470 = vst [vmem:[#allocation15_spill] sm:$0xff] %v3028_v58  ;;  %v883_v34 = vsub.f32 0.0, %v2910_v6  ;;  %v882_v4 = vsub.f32 0.0, %v2959_v0  ;;  %v1753_v31 = vadd.f32 -0.28449672, %v720_v16  ;;  %v884_v25 = vsub.f32 0.0, %v2964_v46 }
 0x173   :  { %3471 = vst [vmem:[#allocation7_spill] sm:$0xff] %v3033_v7  ;;  %v3042_v15 = vmul.f32 0.70710677, %v3015_v3  ;;  %v3045_v27 = vand.u32 2147483647, %v3033_v7  ;;  %v659_v30 = vmul.f32 %v2988_v32, %v1724_v11  ;;  %v846_v48 = vmul.f32 %v2876_v41, %v814_v55  ;;  %v3474_v41 = vld [vmem:[#allocation8_spill] sm:$0xff] }
 0x174   :  { %v501_v39 = vmul.f32 0.3275911, %v3025_v23  ;;  %v3051_v37 = vmul.f32 0.70710677, %v3028_v58  ;;  %v689_v16 = vadd.f32 1.4214138, %v657_v49  ;;  %v915_v28 = vmul.f32 %v883_v34, %v2910_v6 }
 0x175   :  { %3472 = vst [vmem:[#allocation14_spill] sm:$0xff] %v3042_v15  ;;  %v965_v20 = vmul.f32 1.442695, %v913_v56  ;;  %v914_v1 = vmul.f32 %v882_v4, %v2959_v0  ;;  %v3061_v7 = vadd.f32 %v335_v21, %v2242_v44  ;;  %v784_v58 = vmul.f32 %v2924_v61, %v1753_v31  ;;  %v3475_v34 = vld [vmem:[#allocation9_spill] sm:$0xff] }
 0x176   :  { %3473 = vst [vmem:[#allocation17_spill] sm:$0xff] %v3051_v37  ;;  %v3055_v3 = vpop.eup %2044  ;;  %v502_v56 = vmul.f32 0.3275911, %v3045_v27  ;;  %v3069_v11 = vand.u32 2147483647, %v3051_v37  ;;  %vm1066_vm14 = vcmp.ge.f32.partialorder %v3474_v41, 0.0  ;;  %v916_v0 = vmul.f32 %v884_v25, %v2964_v46 }
 0x177   :  { %v3063_v12 = vpop.eup %2046  ;;  %v594_v49 = vmul.f32 1.0614054, %v3055_v3  ;;  %v533_v44 = vadd.f32 1.0, %v501_v39  ;;  %v3075_v55 = vand.u32 2147483647, %v3042_v15  ;;  %vm1068_vm15 = vcmp.ge.f32.partialorder %v3475_v34, 0.0 }
 0x178   :  { %v2049_v8 = vpop.eup %2048  ;;  %v596_v6 = vmul.f32 1.0614054, %v3063_v12  ;;  %v721_v4 = vmul.f32 %v2974_v47, %v689_v16  ;;  %2052 = vpow2.f32 %v965_v20  ;;  %v691_v31 = vadd.f32 1.4214138, %v659_v30  ;;  %v3476_v20 = vld [vmem:[#allocation12_spill] sm:$0xff] }
 0x179   :  { %v1723_v21 = vadd.f32 -1.4531521, %v594_v49  ;;  %v3079_v37 = vmul.f32 %v2049_v8, %v846_v48  ;;  %v967_v10 = vmul.f32 1.442695, %v914_v1  ;;  %v3082_v53 = vmul.f32 0.70710677, %v3061_v7 }
 0x17a   :  { %v1725_v26 = vadd.f32 -1.4531521, %v596_v6  ;;  %v816_v18 = vadd.f32 0.2548296, %v784_v58  ;;  %v534_v25 = vadd.f32 1.0, %v502_v56  ;;  %2054 = vrcp.f32 %v533_v44  ;;  %v3477_v6 = vld [vmem:[#allocation13_spill] sm:$0xff] }
 0x17b   :  { %v658_v46 = vmul.f32 %v3055_v3, %v1723_v21  ;;  %v504_v39 = vmul.f32 0.3275911, %v3069_v11  ;;  %v971_v42 = vmul.f32 1.442695, %v916_v0  ;;  %v503_v30 = vmul.f32 0.3275911, %v3075_v55 }
 0x17c   :  { %v660_v15 = vmul.f32 %v3063_v12, %v1725_v26  ;;  %v1754_v16 = vadd.f32 -0.28449672, %v721_v4  ;;  %v723_v48 = vmul.f32 %v2988_v32, %v691_v31  ;;  %v969_v8 = vmul.f32 1.442695, %v915_v28  ;;  %v3478_v26 = vld [vmem:[#allocation16_spill] sm:$0xff] }
 0x17d   :  { %v690_v1 = vadd.f32 1.4214138, %v658_v46  ;;  %vm1069_vm0 = vcmp.ge.f32.partialorder %v3476_v20, 0.0  ;;  %v1038_v58 = vsub.f32 1.0, %v3079_v37  ;;  %2056 = vpow2.f32 %v967_v10 }
 0x17e   :  { %v692_v49 = vadd.f32 1.4214138, %v660_v15  ;;  %v3092_v56 = vand.u32 2147483647, %v3082_v53  ;;  %vm1071_vm1 = vcmp.ge.f32.partialorder %v3477_v6, 0.0  ;;  %vm1070_vm2 = vcmp.ge.f32.partialorder %v3478_v26, 0.0  ;;  %v2051_v4 = vpop.eup %2050 }
 0x17f   :  { %v848_v0 = vmul.f32 %v2924_v61, %v816_v18  ;;  %v722_v44 = vmul.f32 %v3055_v3, %v690_v1  ;;  %2058 = vrcp.f32 %v534_v25  ;;  %v536_v28 = vadd.f32 1.0, %v504_v39 }
 0x180   :  { %v724_v31 = vmul.f32 %v3063_v12, %v692_v49  ;;  %2060 = vpow2.f32 %v971_v42  ;;  %v535_v37 = vadd.f32 1.0, %v503_v30  ;;  %v505_v10 = vmul.f32 0.3275911, %v3092_v56  ;;  %v408_v49 = vpop.f32.mrf.mxu1 }
 0x181   :  { %v3479_v15 = vsub.f32 1.0, %v2971_v13  ;;  %v785_v46 = vmul.f32 %v2974_v47, %v1754_v16  ;;  %v1756_v18 = vadd.f32 -0.28449672, %v723_v48  ;;  %v1755_v61 = vadd.f32 -0.28449672, %v722_v44 }
 0x182   :  { %v3480_v25 = vsub.f32 1.0, %v2985_v9  ;;  %v3481_v42 = vsub.f32 1.0, %v3020_v43  ;;  %2062 = vpow2.f32 %v969_v8  ;;  %v1757_v1 = vadd.f32 -0.28449672, %v724_v31 }
 0x183   :  { %v1130_v21 = vsel %vm1066_vm14, %v3479_v15, %v3011_v36  ;;  %v3482_v13 = vsub.f32 1.0, %v3022_v50  ;;  %v786_v36 = vmul.f32 %v3055_v3, %v1755_v61  ;;  %2064 = vrcp.f32 %v536_v28  ;;  %v3485_v50 = vld [vmem:[#allocation19_spill] sm:$0xff] }
 0x184   :  { %v1132_v39 = vsel %vm1068_vm15, %v3480_v25, %v3037_v52  ;;  %v1101_v30 = vsub.f32 0.0, %v3481_v42  ;;  %v537_v16 = vadd.f32 1.0, %v505_v10  ;;  %v1102_v48 = vsub.f32 0.0, %v1038_v58 }
 0x185   :  { %v1103_v41 = vsub.f32 0.0, %v3482_v13  ;;  %v1008_v44 = vmul.f32 %v2051_v4, %v848_v0  ;;  %v788_v9 = vmul.f32 %v3063_v12, %v1757_v1  ;;  %2066 = vrcp.f32 %v535_v37  ;;  %v2053_v31 = vpop.eup %2052 }
 0x186   :  { %v817_v34 = vadd.f32 0.2548296, %v785_v46  ;;  %v787_v52 = vmul.f32 %v2988_v32, %v1756_v18  ;;  %v818_v15 = vadd.f32 0.2548296, %v786_v36  ;;  %v3119_v8 = vadd.f32 %v408_v49, %v2244_v45 }
 0x187   :  { %v3123_v25 = vmul.f32 %v3001_v14, %v2778_v29  ;;  %v3127_v28 = vmul.f32 %v3005_v51, %v2788_v19  ;;  %v820_v0 = vadd.f32 0.2548296, %v788_v9  ;;  %2068 = vrcp.f32 %v537_v16 }
 0x188   :  { %v1194_v4 = vadd.f32 1.0, %v1130_v21  ;;  %v1196_v37 = vadd.f32 1.0, %v1132_v39  ;;  %v3483_v10 = vmov %v3481_v42  ;;  %vm1072_vm3 = vcmp.ge.f32.partialorder %v2758_v57, 0.0  ;;  %v3141_v21 = vpop.eup %2054 }
 0x189   :  { %v1133_v46 = vsel %vm1069_vm0, %v3483_v10, %v1101_v30  ;;  %v3484_v45 = vmov %v3482_v13  ;;  %v1134_v19 = vsel %vm1070_vm2, %v1038_v58, %v1102_v48  ;;  %v1040_v14 = vsub.f32 1.0, %v1008_v44 }
 0x18a   :  { %v1135_v29 = vsel %vm1071_vm1, %v3484_v45, %v1103_v41  ;;  %v885_v51 = vsub.f32 0.0, %v3025_v23  ;;  %v849_v43 = vmul.f32 %v2974_v47, %v817_v34  ;;  %v819_v18 = vadd.f32 0.2548296, %v787_v52  ;;  %v2057_v42 = vpop.eup %2056 }
 0x18b   :  { %v850_v20 = vmul.f32 %v3055_v3, %v818_v15  ;;  %v3146_v61 = vmul.f32 0.70710677, %v3119_v8  ;;  %v3149_v39 = vmul.f32 0.5, %v3485_v50  ;;  %v3152_v6 = vmul.f32 0.5, %v2841_v24 }
 0x18c   :  { %v852_v58 = vmul.f32 %v3063_v12, %v820_v0  ;;  %v886_v26 = vsub.f32 0.0, %v3045_v27  ;;  %v3157_v30 = vmul.f32 %v1194_v4, %v2829_v22  ;;  %v3160_v47 = vmul.f32 %v1196_v37, %v2868_v59  ;;  %v3166_v49 = vpop.eup %2058 }
 0x18d   :  { %v3162_v3 = vadd.f32 1.0, %v1133_v46  ;;  %v3164_v1 = vadd.f32 1.0, %v1135_v29  ;;  %v1198_v13 = vadd.f32 1.0, %v1134_v19  ;;  %v1104_v24 = vsub.f32 0.0, %v1040_v14  ;;  %v2061_v36 = vpop.eup %2060 }
 0x18e   :  { %v597_v41 = vmul.f32 1.0614054, %v3141_v21  ;;  %v3170_v12 = vand.u32 2147483647, %v3146_v61  ;;  %v3172_v16 = vmul.f32 %v2053_v31, %v849_v43  ;;  %v851_v22 = vmul.f32 %v2988_v32, %v819_v18 }
 0x18f   :  { %v1010_v59 = vmul.f32 %v2057_v42, %v850_v20  ;;  %v917_v48 = vmul.f32 %v885_v51, %v3025_v23  ;;  %v3176_v44 = vmul.f32 %v2061_v36, %v852_v58  ;;  %v887_v9 = vsub.f32 0.0, %v3075_v55  ;;  %v2063_v15 = vpop.eup %2062  ;;  %v410_v51 = vpop.f32.mrf.mxu1 }
 0x190   :  { %v918_v34 = vmul.f32 %v886_v26, %v3045_v27  ;;  %v507_v52 = vmul.f32 0.3275911, %v3170_v12  ;;  %v3182_v0 = vmul.f32 0.5, %v2861_v54  ;;  %v3185_v31 = vmul.f32 0.5, %v2935_v38  ;;  %v3191_v4 = vpop.eup %2064 }
 0x191   :  { %v3188_v32 = vmul.f32 0.5, %v2938_v35  ;;  %v598_v23 = vmul.f32 1.0614054, %v3166_v49  ;;  %v3194_v37 = vmul.f32 %v1198_v13, %v2944_v17  ;;  %v1136_v27 = vsel %vm1072_vm3, %v1040_v14, %v1104_v24  ;;  %v337_v17 = vpop.f32.mrf.mxu0 }
 0x192   :  { %vm1074_vm4 = vcmp.ge.f32.partialorder %v2948_v62, 0.0  ;;  %v1726_v54 = vadd.f32 -1.4531521, %v597_v41  ;;  %v539_v10 = vadd.f32 1.0, %v507_v52  ;;  %v3199_v46 = vpop.eup %2066  ;;  %v1041_v38 = vsub.f32 1.0, %v3172_v16 }
 0x193   :  { %vm1073_vm5 = vcmp.ge.f32.partialorder %v2871_v63, 0.0  ;;  %v1011_v35 = vmul.f32 %v2063_v15, %v851_v22  ;;  %v1042_v45 = vsub.f32 1.0, %v1010_v59  ;;  %vm1076_vm6 = vcmp.ge.f32.partialorder %v2951_v40, 0.0  ;;  %v3491_v63 = vld [vmem:[#allocation26_spill] sm:$0xff] }
 0x194   :  { %v3204_v29 = vmul.f32 1.442695, %v917_v48  ;;  %v1044_v57 = vsub.f32 1.0, %v3176_v44  ;;  %v3208_v19 = vmul.f32 %v887_v9, %v3075_v55  ;;  %v975_v14 = vmul.f32 1.442695, %v918_v34  ;;  %v3210_v43 = vpop.eup %2068  ;;  %v3486_v44 = vld [vmem:[#allocation25_spill] sm:$0xff] }
 0x195   :  { %2070 = vrcp.f32 %v539_v10  ;;  %v1200_v18 = vadd.f32 1.0, %v1136_v27  ;;  %v1727_v20 = vadd.f32 -1.4531521, %v598_v23  ;;  %v600_v50 = vmul.f32 1.0614054, %v3191_v4 }
 0x196   :  { %v888_v58 = vsub.f32 0.0, %v3069_v11  ;;  %v661_v26 = vmul.f32 %v3141_v21, %v1726_v54  ;;  %v599_v42 = vmul.f32 1.0614054, %v3199_v46  ;;  %v601_v13 = vmul.f32 1.0614054, %v3210_v43 }
 0x197   :  { %v3218_v55 = vadd.f32 %v337_v17, %v3457_v2  ;;  %v1105_v24 = vsub.f32 0.0, %v1041_v38  ;;  %v1043_v41 = vsub.f32 1.0, %v1011_v35  ;;  %vm1075_vm7 = vcmp.ge.f32.partialorder %v2892_v5, 0.0  ;;  %v3487_v35 = vld [vmem:[#allocation22_spill] sm:$0xff]  ;;  %v3488_v17 = vld [vmem:[#allocation20_spill] sm:$0xff] }
 0x198   :  { %v1106_v36 = vsub.f32 0.0, %v1042_v45  ;;  %v3222_v16 = vadd.f32 %v410_v51, %v3458_v33  ;;  %v1108_v22 = vsub.f32 0.0, %v1044_v57  ;;  %v1730_v59 = vadd.f32 -1.4531521, %v601_v13 }
 0x199   :  { %v3225_v48 = vmul.f32 0.70710677, %v3218_v55  ;;  %v1246_v9 = vpack.c.bf16 %v3486_v44, %v2845_v60  ;;  %v3230_v34 = vmul.f32 %v1200_v18, %v3149_v39  ;;  %v662_v2 = vmul.f32 %v3166_v49, %v1727_v20 }
 0x19a   :  { %2072 = vpow2.f32 %v975_v14  ;;  %v1729_v52 = vadd.f32 -1.4531521, %v600_v50  ;;  %v1728_v15 = vadd.f32 -1.4531521, %v599_v42  ;;  %v3234_v23 = vmul.f32 %v888_v58, %v3069_v11 }
 0x19b   :  { %v665_v33 = vmul.f32 %v3210_v43, %v1730_v59  ;;  %v3238_v27 = vand.u32 2147483647, %v3225_v48  ;;  %1556 = vmatprep.mubr.bf16.mxu0 %v1246_v9  ;;  %v1138_v60 = vsel %vm1074_vm4, %v1042_v45, %v1106_v36  ;;  %v693_v54 = vadd.f32 1.4214138, %v661_v26  ;;  %v3490_v36 = vld [vmem:[#allocation24_spill] sm:$0xff]  ;;  %v3492_v9 = vld [vmem:[#allocation11_spill] sm:$0xff] }
 0x19c   :  { %v889_v39 = vsub.f32 0.0, %v3092_v56  ;;  %v3244_v10 = vmul.f32 0.70710677, %v3222_v16  ;;  %v3489_v14 = vpack.c.bf16 %v3487_v35, %v3488_v17  ;;  %v1137_v11 = vsel %vm1073_vm5, %v1041_v38, %v1105_v24  ;;  %v3494_v35 = vld [vmem:[#allocation21_spill] sm:$0xff] }
 0x19d   :  { %v1107_v51 = vsub.f32 0.0, %v1043_v41  ;;  %v1140_v18 = vsel %vm1076_vm6, %v1044_v57, %v1108_v22  ;;  %v506_v62 = vmul.f32 0.3275911, %v3238_v27  ;;  %v694_v45 = vadd.f32 1.4214138, %v662_v2 }
 0x19e   :  { %1557 = vmatmul.mubr.bf16.vlgmr.msra.gmra.mxu0 %v3489_v14  ;;  %v664_v20 = vmul.f32 %v3191_v4, %v1729_v52  ;;  %v697_v50 = vadd.f32 1.4214138, %v665_v33  ;;  %v3256_v58 = vand.u32 2147483647, %v3244_v10  ;;  %v1202_v26 = vadd.f32 1.0, %v1138_v60  ;;  %v3496_v14 = vld [vmem:[#allocation18_spill] sm:$0xff] }
 0x19f   :  { %v663_v42 = vmul.f32 %v3199_v46, %v1728_v15  ;;  %v538_v13 = vadd.f32 1.0, %v506_v62  ;;  %v1248_v38 = vpack.c.bf16 %v3491_v63, %v3490_v36  ;;  %v1204_v24 = vadd.f32 1.0, %v1140_v18 }
 0x1a0   :  { %v921_v40 = vmul.f32 %v889_v39, %v3092_v56  ;;  %v891_v57 = vsub.f32 0.0, %v3170_v12  ;;  %v508_v22 = vmul.f32 0.3275911, %v3256_v58  ;;  %v1139_v59 = vsel %vm1075_vm7, %v1043_v41, %v1107_v51  ;;  %v3493_v39 = vld [vmem:[#allocation23_spill] sm:$0xff] }
 0x1a1   :  { %v725_v44 = vmul.f32 %v3141_v21, %v693_v54  ;;  %2074 = vrcp.f32 %v538_v13  ;;  %1621 = vmatprep.mubr.bf16.mxu1 %v1248_v38  ;;  %v1250_v2 = vpack.c.bf16 %v3157_v30, %v3492_v9  ;;  %v726_v15 = vmul.f32 %v3166_v49, %v694_v45  ;;  %v3497_v13 = vld [vmem:[#allocation27_spill] sm:$0xff] }
 0x1a2   :  { %v3269_v52 = vpop.eup %2070  ;;  %v696_v33 = vadd.f32 1.4214138, %v664_v20  ;;  %v729_v56 = vmul.f32 %v3210_v43, %v697_v50  ;;  %v540_v60 = vadd.f32 1.0, %v508_v22  ;;  %v3495_v17 = vpack.c.bf16 %v3493_v39, %v3494_v35 }
 0x1a3   :  { %v1234_v5 = vmul.f32 %v1202_v26, %v3185_v31  ;;  %v695_v41 = vadd.f32 1.4214138, %v663_v42  ;;  %v603_v54 = vmul.f32 1.0614054, %v3269_v52  ;;  %1564 = vmatprep.mubr.bf16.mxu0 %v1250_v2  ;;  %v1252_v30 = vpack.c.bf16 %v3160_v47, %v3496_v14 }
 0x1a4   :  { %1622 = vmatmul.mubr.bf16.vlgmr.msra.gmra.mxu1 %v3495_v17  ;;  %v1201_v51 = vadd.f32 1.0, %v1137_v11  ;;  %v1236_v18 = vmul.f32 %v1204_v24, %v3188_v32  ;;  %v981_v62 = vmul.f32 1.442695, %v921_v40  ;;  %v923_v45 = vmul.f32 %v891_v57, %v3170_v12  ;;  %v3498_v40 = vld [vmem:[#allocation28_spill] sm:$0xff] }
 0x1a5   :  { %v1758_v20 = vadd.f32 -0.28449672, %v725_v44  ;;  %v1732_v50 = vadd.f32 -1.4531521, %v603_v54  ;;  %2076 = vrcp.f32 %v540_v60  ;;  %1629 = vmatprep.mubr.bf16.mxu1 %v1252_v30  ;;  %v1249_v31 = vpack.c.bf16 %v3123_v25, %v3497_v13  ;;  %v3500_v60 = vld [vmem:[#allocation5_spill] sm:$0xff] }
 0x1a6   :  { %v1203_v26 = vadd.f32 1.0, %v1139_v59  ;;  %v1759_v42 = vadd.f32 -0.28449672, %v726_v15  ;;  %v728_v36 = vmul.f32 %v3191_v4, %v696_v33  ;;  %v1762_v63 = vadd.f32 -0.28449672, %v729_v56  ;;  %v3499_v33 = vld [vmem:[#allocation4_spill] sm:$0xff] }
 0x1a7   :  { %v3285_v38 = vpop.eup %2072  ;;  %v727_v47 = vmul.f32 %v3199_v46, %v695_v41  ;;  %v667_v32 = vmul.f32 %v3269_v52, %v1732_v50  ;;  %v890_v12 = vsub.f32 0.0, %v3238_v27  ;;  %1565 = vmatmul.mubr.bf16.gmra.mxu0 %v1249_v31  ;;  %v1254_v11 = vpack.c.bf16 %v1234_v5, %v3194_v37 }
 0x1a8   :  { %2078 = vpow2.f32 %v981_v62  ;;  %v985_v24 = vmul.f32 1.442695, %v923_v45  ;;  %v1251_v25 = vpack.c.bf16 %v3127_v28, %v3498_v40  ;;  %v1256_v57 = vpack.c.bf16 %v1236_v18, %v3230_v34 }
 0x1a9   :  { %v1233_v22 = vmul.f32 %v1201_v51, %v3152_v6  ;;  %2080 = vpow2.f32 %v3204_v29  ;;  %v979_v59 = vmul.f32 1.442695, %v3234_v23  ;;  %v699_v44 = vadd.f32 1.4214138, %v667_v32  ;;  %1572 = vmatprep.mubr.bf16.mxu0 %v1254_v11 }
 0x1aa   :  { %v977_v9 = vmul.f32 1.442695, %v3208_v19  ;;  %v790_v2 = vmul.f32 %v3166_v49, %v1759_v42  ;;  %v1761_v37 = vadd.f32 -0.28449672, %v728_v36  ;;  %v793_v15 = vmul.f32 %v3210_v43, %v1762_v63 }
 0x1ab   :  { %v1229_v28 = vmul.f32 %v3162_v3, %v3499_v33  ;;  %v731_v34 = vmul.f32 %v3269_v52, %v699_v44  ;;  %v922_v6 = vmul.f32 %v890_v12, %v3238_v27  ;;  %v892_v29 = vsub.f32 0.0, %v3256_v58 }
 0x1ac   :  { %1630 = vmatmul.mubr.bf16.gmra.mxu1 %v1251_v25  ;;  %v1235_v23 = vmul.f32 %v1203_v26, %v3182_v0  ;;  %v789_v19 = vmul.f32 %v3141_v21, %v1758_v20  ;;  %v1760_v56 = vadd.f32 -0.28449672, %v727_v47  ;;  %2082 = vpow2.f32 %v985_v24 }
 0x1ad   :  { %1637 = vmatprep.mubr.bf16.mxu1 %v1256_v57  ;;  %v1231_v39 = vmul.f32 %v3164_v1, %v3500_v60  ;;  %2084 = vpow2.f32 %v979_v59  ;;  %v1764_v35 = vadd.f32 -0.28449672, %v731_v34  ;;  %v1253_v17 = vpack.c.bf16 %v1233_v22, %v1229_v28 }
 0x1ae   :  { %v2075_v3 = vpop.eup %2074  ;;  %2086 = vpow2.f32 %v977_v9  ;;  %v822_v5 = vadd.f32 0.2548296, %v790_v2  ;;  %v792_v27 = vmul.f32 %v3191_v4, %v1761_v37  ;;  %v825_v41 = vadd.f32 0.2548296, %v793_v15 }
 0x1af   :  { %v795_v54 = vmul.f32 %v3269_v52, %v1764_v35  ;;  %v602_v14 = vmul.f32 1.0614054, %v2075_v3  ;;  %v983_v0 = vmul.f32 1.442695, %v922_v6  ;;  %v924_v30 = vmul.f32 %v892_v29, %v3256_v58  ;;  %1573 = vmatmul.mubr.bf16.gmra.mxu0 %v1253_v17 }
 0x1b0   :  { %v821_v51 = vadd.f32 0.2548296, %v789_v19  ;;  %v791_v18 = vmul.f32 %v3199_v46, %v1760_v56  ;;  %v1255_v1 = vpack.c.bf16 %v1235_v23, %v1231_v39  ;;  %v854_v20 = vmul.f32 %v3166_v49, %v822_v5 }
 0x1b1   :  { %v1731_v62 = vadd.f32 -1.4531521, %v602_v14  ;;  %v824_v50 = vadd.f32 0.2548296, %v792_v27  ;;  %v857_v13 = vmul.f32 %v3210_v43, %v825_v41  ;;  %v827_v31 = vadd.f32 0.2548296, %v795_v54 }
 0x1b2   :  { %v2077_v45 = vpop.eup %2076  ;;  %2088 = vpow2.f32 %v983_v0  ;;  %v987_v36 = vmul.f32 1.442695, %v924_v30  ;;  %v853_v58 = vmul.f32 %v3141_v21, %v821_v51  ;;  %v823_v63 = vadd.f32 0.2548296, %v791_v18  ;;  %v3501_v14 = vld [vmem:[#allocation2_spill] sm:$0xff]  ;;  %v3502_v0 = vld [vmem:[#allocation7_spill] sm:$0xff] }
 0x1b3   :  { %v666_v26 = vmul.f32 %v2075_v3, %v1731_v62  ;;  %v604_v42 = vmul.f32 1.0614054, %v2077_v45  ;;  %v1014_v24 = vmul.f32 %v3285_v38, %v854_v20  ;;  %v859_v49 = vmul.f32 %v3269_v52, %v827_v31 }
 0x1b4   :  { %1638 = vmatmul.mubr.bf16.gmra.mxu1 %v1255_v1  ;;  %v856_v43 = vmul.f32 %v3191_v4, %v824_v50  ;;  %2090 = vpow2.f32 %v987_v36  ;;  %v855_v59 = vmul.f32 %v3199_v46, %v823_v63  ;;  %vm1081_vm8 = vcmp.ge.f32.partialorder %v3082_v53, 0.0 }
 0x1b5   :  { %v2079_v47 = vpop.eup %2078  ;;  %v698_v32 = vadd.f32 1.4214138, %v666_v26  ;;  %v1733_v12 = vadd.f32 -1.4531521, %v604_v42  ;;  %v1046_v28 = vsub.f32 1.0, %v1014_v24  ;;  %vm1077_vm9 = vcmp.ge.f32.partialorder %v3501_v14, 0.0 }
 0x1b6   :  { %v2081_v11 = vpop.eup %2080  ;;  %v1017_v40 = vmul.f32 %v2079_v47, %v857_v13  ;;  %vm1078_vm10 = vcmp.ge.f32.partialorder %v3502_v0, 0.0  ;;  %v3503_v13 = vld [vmem:[#allocation14_spill] sm:$0xff]  ;;  %v3504_v26 = vld [vmem:[#allocation17_spill] sm:$0xff]  ;;  %vm1083_vm13 = vcmp.ge.f32.partialorder %v3146_v61, 0.0  ;;  %v1177_v63 = vmul.f32 0.5, %v3061_v7 }
 0x1b7   :  { %v730_v25 = vmul.f32 %v2075_v3, %v698_v32  ;;  %v668_v57 = vmul.f32 %v2077_v45, %v1733_v12  ;;  %v1013_v22 = vmul.f32 %v2081_v11, %v853_v58  ;;  %v1110_v60 = vsub.f32 0.0, %v1046_v28 }
 0x1b8   :  { %v1049_v37 = vsub.f32 1.0, %v1017_v40  ;;  %vm1079_vm11 = vcmp.ge.f32.partialorder %v3503_v13, 0.0  ;;  %vm1080_vm12 = vcmp.ge.f32.partialorder %v3504_v26, 0.0  ;;  %vm1082_vm14 = vcmp.ge.f32.partialorder %v3225_v48, 0.0  ;;  %v3505_v40 = vld [vmem:[#allocation6_spill] sm:$0xff] }
 0x1b9   :  { %v2083_v44 = vpop.eup %2082  ;;  %v1763_v21 = vadd.f32 -0.28449672, %v730_v25  ;;  %v700_v9 = vadd.f32 1.4214138, %v668_v57  ;;  %v1045_v52 = vsub.f32 1.0, %v1013_v22  ;;  %v1142_v18 = vsel %vm1078_vm10, %v1046_v28, %v1110_v60  ;;  %v3506_v57 = vld [vmem:[#allocation10_spill] sm:$0xff] }
 0x1ba   :  { %v2085_v2 = vpop.eup %2084  ;;  %v1019_v15 = vmul.f32 %v2083_v44, %v859_v49  ;;  %v1113_v19 = vsub.f32 0.0, %v1049_v37  ;;  %v1206_v58 = vadd.f32 1.0, %v1142_v18  ;;  %v1174_v49 = vmul.f32 0.5, %v3505_v40 }
 0x1bb   :  { %v2087_v33 = vpop.eup %2086  ;;  %v1016_v38 = vmul.f32 %v2085_v2, %v856_v43  ;;  %v794_v34 = vmul.f32 %v2075_v3, %v1763_v21  ;;  %v732_v6 = vmul.f32 %v2077_v45, %v700_v9  ;;  %v1109_v5 = vsub.f32 0.0, %v1045_v52 }
 0x1bc   :  { %v1015_v29 = vmul.f32 %v2087_v33, %v855_v59  ;;  %v1051_v56 = vsub.f32 1.0, %v1019_v15  ;;  %v1145_v30 = vsel %vm1081_vm8, %v1049_v37, %v1113_v19  ;;  %v1178_v43 = vmul.f32 0.5, %v3218_v55  ;;  %v3507_v33 = vld [vmem:[#allocation15_spill] sm:$0xff] }
 0x1bd   :  { %v826_v4 = vadd.f32 0.2548296, %v794_v34  ;;  %v1765_v23 = vadd.f32 -0.28449672, %v732_v6  ;;  %v1048_v39 = vsub.f32 1.0, %v1016_v38  ;;  %v1209_v53 = vadd.f32 1.0, %v1145_v30 }
 0x1be   :  { %v1047_v27 = vsub.f32 1.0, %v1015_v29  ;;  %v1115_v51 = vsub.f32 0.0, %v1051_v56  ;;  %v1173_v61 = vmul.f32 0.5, %v3506_v57  ;;  %v1238_v21 = vmul.f32 %v1206_v58, %v1174_v49  ;;  %v3508_v6 = vld [vmem:[#allocation3_spill] sm:$0xff] }
 0x1bf   :  { %v858_v46 = vmul.f32 %v2075_v3, %v826_v4  ;;  %v796_v35 = vmul.f32 %v2077_v45, %v1765_v23  ;;  %v2089_v17 = vpop.eup %2088  ;;  %v1112_v1 = vsub.f32 0.0, %v1048_v39  ;;  %v1141_v3 = vsel %vm1077_vm9, %v1045_v52, %v1109_v5 }
 0x1c0   :  { %v1111_v31 = vsub.f32 0.0, %v1047_v27  ;;  %v1147_v47 = vsel %vm1083_vm13, %v1051_v56, %v1115_v51  ;;  %v1205_v32 = vadd.f32 1.0, %v1141_v3  ;;  %v1241_v22 = vmul.f32 %v1209_v53, %v1177_v63 }
 0x1c1   :  { %v1018_v41 = vmul.f32 %v2089_v17, %v858_v46  ;;  %v828_v54 = vadd.f32 0.2548296, %v796_v35  ;;  %v2091_v50 = vpop.eup %2090  ;;  %v1211_v59 = vadd.f32 1.0, %v1147_v47  ;;  %vm1084_vm15 = vcmp.ge.f32.partialorder %v3244_v10, 0.0 }
 0x1c2   :  { %v1143_v24 = vsel %vm1079_vm11, %v1047_v27, %v1111_v31  ;;  %v1237_v48 = vmul.f32 %v1205_v32, %v1173_v61  ;;  %v1179_v37 = vmul.f32 0.5, %v3119_v8  ;;  %v1176_v28 = vmul.f32 0.5, %v3507_v33 }
 0x1c3   :  { %v1050_v62 = vsub.f32 1.0, %v1018_v41  ;;  %v860_v20 = vmul.f32 %v2077_v45, %v828_v54  ;;  %v1144_v45 = vsel %vm1080_vm12, %v1048_v39, %v1112_v1  ;;  %v1207_v2 = vadd.f32 1.0, %v1143_v24 }
 0x1c4   :  { %v1208_v7 = vadd.f32 1.0, %v1144_v45  ;;  %v1180_v55 = vmul.f32 0.5, %v3222_v16  ;;  %v1175_v52 = vmul.f32 0.5, %v3508_v6  ;;  %v1243_v29 = vmul.f32 %v1211_v59, %v1179_v37  ;;  %v3339_v16 = vld [vmem:[%s3377_s4] ss:$0 sm:$0xff] }
 0x1c5   :  { %v1114_v42 = vsub.f32 0.0, %v1050_v62  ;;  %v1020_v36 = vmul.f32 %v2091_v50, %v860_v20  ;;  %v1257_v4 = vpack.c.bf16 %v1241_v22, %v1237_v48 }
 0x1c6   :  { %v1240_v23 = vmul.f32 %v1208_v7, %v1176_v28  ;;  %v1239_v56 = vmul.f32 %v1207_v2, %v1175_v52 }
 0x1c7   :  { %v1146_v12 = vsel %vm1082_vm14, %v1050_v62, %v1114_v42  ;;  %v1052_v11 = vsub.f32 1.0, %v1020_v36 }
 0x1c8   :  { %v1210_v25 = vadd.f32 1.0, %v1146_v12  ;;  %v1259_v60 = vpack.c.bf16 %v1243_v29, %v1239_v56 }
 0x1c9   :  { %v1116_v44 = vsub.f32 0.0, %v1052_v11 }
 0x1ca   :  { %v1242_v9 = vmul.f32 %v1210_v25, %v1178_v43 }
 0x1cb   :  { %v1148_v15 = vsel %vm1084_vm15, %v1052_v11, %v1116_v44 }
 0x1cc   :  { %v1212_v38 = vadd.f32 1.0, %v1148_v15  ;;  %v1258_v34 = vpack.c.bf16 %v1242_v9, %v1238_v21 }
 0x1ce   :  { %v1244_v19 = vmul.f32 %v1212_v38, %v1180_v55  ;;  %1580 = vmatprep.mubr.bf16.mxu0 %v1258_v34 }
 0x1cf   :  { %1581 = vmatmul.mubr.bf16.gmra.mxu0 %v1257_v4 }
 0x1d0   :  { %v1260_v10 = vpack.c.bf16 %v1244_v19, %v1240_v23 }
 0x1d2   :  { %1645 = vmatprep.mubr.bf16.mxu1 %v1260_v10 }
 0x1d3   :  { %1646 = vmatmul.mubr.bf16.gmra.mxu1 %v1259_v60 }
 0x25e   :  { %v1815_v8 = vpop.f32.mrf.mxu0 }
 0x260   :  { %v1816_v39 = vpop.f32.mrf.mxu0 }
 0x261   :  { %v1817_v46 = vadd.f32 %v1816_v39, %v1815_v8 }
 0x262   :  { %v1818_v35 = vpop.f32.mrf.mxu0 }
 0x263   :  { %v1559_v27 = vadd.f32 %v1817_v46, %v3339_v16 }
 0x264   :  { %v1855_v17 = vpop.f32.mrf.mxu1  ;;  %v1819_v5 = vpop.f32.mrf.mxu0 }
 0x265   :  { %v1820_v41 = vadd.f32 %v1819_v5, %v1818_v35 }
 0x266   :  { %v1856_v54 = vpop.f32.mrf.mxu1 }
 0x267   :  { %v1857_v14 = vadd.f32 %v1856_v54, %v1855_v17  ;;  %v1562_v51 = vadd.f32 %v1820_v41, %v3339_v16  ;;  %v1821_v18 = vpop.f32.mrf.mxu0 }
 0x268   :  { %v1858_v0 = vpop.f32.mrf.mxu1 }
 0x269   :  { %v1624_v30 = vadd.f32 %v1857_v14, %v1559_v27  ;;  %v1822_v20 = vpop.f32.mrf.mxu0 }
 0x26a   :  { %v1859_v1 = vpop.f32.mrf.mxu1  ;;  %v1823_v3 = vadd.f32 %v1822_v20, %v1821_v18 }
 0x26b   :  { %1654 = vst [vmem:[%s3378_s5] sm:$0xff] %v1624_v30  ;;  %v1860_v62 = vadd.f32 %v1859_v1, %v1858_v0  ;;  %v1824_v31 = vpop.f32.mrf.mxu0 }
 0x26c   :  { %v1861_v50 = vpop.f32.mrf.mxu1  ;;  %v1567_v26 = vadd.f32 %v1823_v3, %v3339_v16 }
 0x26d   :  { %v1627_v13 = vadd.f32 %v1860_v62, %v1562_v51  ;;  %v1825_v36 = vpop.f32.mrf.mxu0 }
 0x26e   :  { %v1862_v53 = vpop.f32.mrf.mxu1  ;;  %v1826_v63 = vadd.f32 %v1825_v36, %v1824_v31 }
 0x26f   :  { %1655 = vst [vmem:[%s3378_s5 + $0x8] sm:$0xff] %v1627_v13  ;;  %v1863_v42 = vadd.f32 %v1862_v53, %v1861_v50  ;;  %v1827_v32 = vpop.f32.mrf.mxu0 }
 0x270   :  { %v1864_v58 = vpop.f32.mrf.mxu1  ;;  %v1570_v45 = vadd.f32 %v1826_v63, %v3339_v16 }
 0x271   :  { %v1632_v47 = vadd.f32 %v1863_v42, %v1567_v26  ;;  %v1828_v24 = vpop.f32.mrf.mxu0 }
 0x272   :  { %v1865_v12 = vpop.f32.mrf.mxu1  ;;  %v1829_v49 = vadd.f32 %v1828_v24, %v1827_v32 }
 0x273   :  { %1656 = vst [vmem:[%s3378_s5 + $0x10] sm:$0xff] %v1632_v47  ;;  %v1866_v11 = vadd.f32 %v1865_v12, %v1864_v58  ;;  %v1830_v25 = vpop.f32.mrf.mxu0 }
 0x274   :  { %v1867_v40 = vpop.f32.mrf.mxu1  ;;  %v1575_v57 = vadd.f32 %v1829_v49, %v3339_v16 }
 0x275   :  { %v1635_v43 = vadd.f32 %v1866_v11, %v1570_v45  ;;  %v1831_v59 = vpop.f32.mrf.mxu0 }
 0x276   :  { %v1868_v61 = vpop.f32.mrf.mxu1  ;;  %v1832_v21 = vadd.f32 %v1831_v59, %v1830_v25 }
 0x277   :  { %1657 = vst [vmem:[%s3378_s5 + $0x18] sm:$0xff] %v1635_v43  ;;  %v1869_v22 = vadd.f32 %v1868_v61, %v1867_v40 }
 0x278   :  { %v1870_v44 = vpop.f32.mrf.mxu1  ;;  %v1578_v9 = vadd.f32 %v1832_v21, %v3339_v16 }
 0x279   :  { %v1640_v7 = vadd.f32 %v1869_v22, %v1575_v57 }
 0x27a   :  { %v1871_v48 = vpop.f32.mrf.mxu1 }
 0x27b   :  { %1658 = vst [vmem:[%s3378_s5 + $0x20] sm:$0xff] %v1640_v7  ;;  %v1872_v2 = vadd.f32 %v1871_v48, %v1870_v44 }
 0x27d   :  { %v1643_v37 = vadd.f32 %v1872_v2, %v1578_v9 }
 0x27f   :  { %1659 = vst [vmem:[%s3378_s5 + $0x28] sm:$0xff] %v1643_v37 }
 0x28f   :  { %v1833_v15 = vpop.f32.mrf.mxu0 }
 0x291   :  { %v1834_v33 = vpop.f32.mrf.mxu0 }
 0x292   :  { %v1835_v28 = vadd.f32 %v1834_v33, %v1833_v15 }
 0x293   :  { %v1873_v55 = vpop.f32.mrf.mxu1  ;;  %v1836_v38 = vpop.f32.mrf.mxu0 }
 0x294   :  { %v1583_v34 = vadd.f32 %v1835_v28, %v3339_v16 }
 0x295   :  { %v1874_v6 = vpop.f32.mrf.mxu1  ;;  %v1837_v52 = vpop.f32.mrf.mxu0 }
 0x296   :  { %v1875_v29 = vadd.f32 %v1874_v6, %v1873_v55  ;;  %v1838_v4 = vadd.f32 %v1837_v52, %v1836_v38 }
 0x297   :  { %v1876_v23 = vpop.f32.mrf.mxu1 }
 0x298   :  { %v1648_v19 = vadd.f32 %v1875_v29, %v1583_v34  ;;  %v1586_v56 = vadd.f32 %v1838_v4, %v3339_v16 }
 0x299   :  { %v1877_v10 = vpop.f32.mrf.mxu1 }
 0x29a   :  { %1660 = vst [vmem:[%s3378_s5 + $0x30] sm:$0xff] %v1648_v19  ;;  %v1878_v60 = vadd.f32 %v1877_v10, %v1876_v23 }
 0x29c   :  { %v1651_v8 = vadd.f32 %v1878_v60, %v1586_v56 }
 0x29e   :  { %1661 = vst [vmem:[%s3378_s5 + $0x38] sm:$0xff] %v1651_v8 }

</bundles_post_ra>
